<compile_context>
chip_gen: v5e
topology: v5e:2x2
jax: 0.10.0
libtpu: 0.0.40
codegen_flags: <defaults>
</compile_context>

<pallas_src>
import jax
import jax.numpy as jnp
import numpy as np
from jax.experimental import pallas as pl
from jax.experimental.pallas import tpu as pltpu

KH = KW = 4
STRIDE = 2
PAD = 1
BN_EPS = 1e-5

_VMEM_BUDGET = 28 * 1024 * 1024   # tile-selection budget; leaves headroom on v7x (64 MiB/TC)


def _round_up(x, m):
    return (x + m - 1) // m * m


# ----------------------------- Pallas kernels -----------------------------

def _matmul_stats_kernel_1k(a_ref, b_ref, y_ref, s1_ref, s2_ref):
    """Single-K-step path: (tm, K) @ (K, Cp), bf16 operands, f32 accumulation.
    Fused epilogue writes the bf16 y tile plus per-channel sum / sum-of-squares
    partials for the BatchNorm statistics (no extra HBM read of y)."""
    acc = jnp.dot(a_ref[...], b_ref[...], preferred_element_type=jnp.float32)
    y_ref[...] = acc.astype(y_ref.dtype)
    s1_ref[...] = jnp.sum(acc, axis=0, keepdims=True)
    s2_ref[...] = jnp.sum(acc * acc, axis=0, keepdims=True)


def _matmul_stats_kernel_ktiled(a_ref, b_ref, y_ref, s1_ref, s2_ref, acc_ref):
    """K-tiled variant (only when a single K block would exceed the VMEM budget):
    f32 VMEM accumulator, init/finalize via pl.when, reduction axis last."""
    k = pl.program_id(2)

    @pl.when(k == 0)
    def _():
        acc_ref[...] = jnp.zeros_like(acc_ref)

    acc_ref[...] += jnp.dot(a_ref[...], b_ref[...],
                            preferred_element_type=jnp.float32)

    @pl.when(k == pl.num_programs(2) - 1)
    def _():
        acc = acc_ref[...]
        y_ref[...] = acc.astype(y_ref.dtype)
        s1_ref[...] = jnp.sum(acc, axis=0, keepdims=True)
        s2_ref[...] = jnp.sum(acc * acc, axis=0, keepdims=True)


def _bn_relu_kernel(y_ref, scale_ref, shift_ref, o_ref):
    """Per-channel affine with precomputed batch-stat scale/shift, then ReLU.
    Reads bf16 y, computes in f32, stores bf16 (halves the dominant HBM write)."""
    y = y_ref[...].astype(jnp.float32)
    o_ref[...] = jnp.maximum(y * scale_ref[...] + shift_ref[...],
                             0.0).astype(o_ref.dtype)


# ------------------- sub-pixel decomposition (thin JAX glue) -------------------

def _taps(par):
    # For output parity `par` (0 = even, 1 = odd): the two contributing kernel taps
    # (ky) and their start offsets (sy) in the 1-padded input (iy_pad = sy + h).
    return ((1, 1), (3, 0)) if par == 0 else ((0, 2), (2, 1))


def _build_subpixel_operands(x_nhwc_pad, w):
    """A: (4, N*H*W, 4*Ci) zero-free patches with tap-major / Ci-minor K layout,
    B: (4, 4*Ci, Co) matching weights.  Built from the channels-last padded input
    with lane-preserving slices + minor-dim concat only (no major-dim transpose)."""
    N, Hp, Wp, Ci = x_nhwc_pad.shape
    H, W = Hp - 2, Wp - 2
    a_list, b_list = [], []
    for py in range(2):
        for px in range(2):
            a_slabs, b_slabs = [], []
            for (ky, sy) in _taps(py):
                for (kx, sx) in _taps(px):
                    a_slabs.append(x_nhwc_pad[:, sy:sy + H, sx:sx + W, :])
                    b_slabs.append(w[:, :, ky, kx])            # (Ci, Co)
            a = jnp.concatenate(a_slabs, axis=-1)               # (N, H, W, 4*Ci)
            a_list.append(a.reshape(N * H * W, 4 * Ci))
            b_list.append(jnp.concatenate(b_slabs, axis=0))     # (4*Ci, Co)
    return jnp.stack(a_list, axis=0), jnp.stack(b_list, axis=0)


# ------------------------- tile / VMEM sizing -------------------------

def _vmem_block_bytes(rows, cols, dtype_bytes):
    # account for lane (128) / sublane (8 f32, 16 bf16) padding of VMEM buffers
    sub = 8 * (4 // dtype_bytes)
    return _round_up(rows, sub) * _round_up(cols, 128) * dtype_bytes


def _matmul_footprint(tm, tk, cp):
    return (2 * _vmem_block_bytes(tm, tk, 2)       # A block, double-buffered (bf16)
            + 2 * _vmem_block_bytes(tk, cp, 2)     # B block, double-buffered (bf16)
            + 2 * _vmem_block_bytes(tm, cp, 2)     # y block, double-buffered (bf16)
            + _vmem_block_bytes(tm, cp, 4)         # f32 accumulator scratch
            + 4 * _vmem_block_bytes(1, cp, 4))     # stats blocks (tiny)


def _bn_footprint(tm, cp):
    return (4 * _vmem_block_bytes(tm, cp, 2)       # y in + out, double-buffered
            + 4 * _vmem_block_bytes(1, cp, 4))     # scale / shift


def _vmem_limit(footprint):
    return min(max(footprint + 4 * 1024 * 1024, 16 * 1024 * 1024),
               60 * 1024 * 1024)


def _pick_tiles(M, K, Cp):
    m8 = _round_up(M, 8)
    tm = min(1024 if M >= 1024 else 512, m8)
    # Prefer a single K step (no accumulator, B VMEM-resident per parity);
    # shrink the M tile (not below 256) before splitting K.
    while _matmul_footprint(tm, K, Cp) > _VMEM_BUDGET and tm > 256:
        tm = max(256, _round_up(tm // 2, 8))
    tk = K
    while (_matmul_footprint(tm, tk, Cp) > _VMEM_BUDGET
           and tk % 2 == 0 and (tk // 2) % 128 == 0):
        tk //= 2
    return tm, tk


# ------------------------- wrapper -------------------------

def upconv_forward(x, w, gamma, beta):
    N, Ci, H, W = x.shape
    Ci_w, Co, kh, kw = w.shape
    assert Ci == Ci_w and kh == KH and kw == KW
    OH, OW = STRIDE * H, STRIDE * W

    # channels-last bf16 copy of x (1x-input transpose), zero-padded spatially
    x_nhwc = jnp.transpose(x.astype(jnp.bfloat16), (0, 2, 3, 1))
    x_pad = jnp.pad(x_nhwc, ((0, 0), (1, 1), (1, 1), (0, 0)))
    a, b = _build_subpixel_operands(x_pad, w.astype(jnp.bfloat16))

    M, K = a.shape[1], a.shape[2]
    Cp = _round_up(Co, 128)              # lane-dense, unmasked stores
    tm, tk = _pick_tiles(M, K, Cp)
    Mp = _round_up(M, tm)
    n_m, n_k = Mp // tm, K // tk

    if Mp != M:                          # zero rows: neutral for the BN statistics
        a = jnp.pad(a, ((0, 0), (0, Mp - M), (0, 0)))
    if Cp != Co:                         # zero cols: neutralized by zero gamma/beta pad
        b = jnp.pad(b, ((0, 0), (0, 0), (0, Cp - Co)))

    matmul_vmem = _vmem_limit(_matmul_footprint(tm, tk, Cp))
    y_sds = jax.ShapeDtypeStruct((4, Mp, Cp), jnp.bfloat16)
    st_sds = jax.ShapeDtypeStruct((4, n_m, 1, Cp), jnp.float32)

    # --- Pallas pass 1: bf16 matmul + fused per-tile BN-stat partials ---
    if n_k == 1:
        y, s1p, s2p = pl.pallas_call(
            _matmul_stats_kernel_1k,
            out_shape=(y_sds, st_sds, st_sds),
            grid_spec=pltpu.PrefetchScalarGridSpec(
                num_scalar_prefetch=0,
                grid=(4, n_m),
                in_specs=[
                    pl.BlockSpec((pl.Squeezed(), tm, K), lambda s, i: (s, i, 0)),
                    # constant block index across i -> B stays VMEM-resident per parity
                    pl.BlockSpec((pl.Squeezed(), K, Cp), lambda s, i: (s, 0, 0)),
                ],
                out_specs=[
                    pl.BlockSpec((pl.Squeezed(), tm, Cp), lambda s, i: (s, i, 0)),
                    pl.BlockSpec((pl.Squeezed(), pl.Squeezed(), 1, Cp),
                                 lambda s, i: (s, i, 0, 0)),
                    pl.BlockSpec((pl.Squeezed(), pl.Squeezed(), 1, Cp),
                                 lambda s, i: (s, i, 0, 0)),
                ],
            ),
            compiler_params=pltpu.CompilerParams(
                dimension_semantics=("parallel", "parallel"),
                vmem_limit_bytes=matmul_vmem),
        )(a, b)
    else:
        y, s1p, s2p = pl.pallas_call(
            _matmul_stats_kernel_ktiled,
            out_shape=(y_sds, st_sds, st_sds),
            grid_spec=pltpu.PrefetchScalarGridSpec(
                num_scalar_prefetch=0,
                grid=(4, n_m, n_k),
                in_specs=[
                    pl.BlockSpec((pl.Squeezed(), tm, tk), lambda s, i, k: (s, i, k)),
                    pl.BlockSpec((pl.Squeezed(), tk, Cp), lambda s, i, k: (s, k, 0)),
                ],
                out_specs=[
                    pl.BlockSpec((pl.Squeezed(), tm, Cp), lambda s, i, k: (s, i, 0)),
                    pl.BlockSpec((pl.Squeezed(), pl.Squeezed(), 1, Cp),
                                 lambda s, i, k: (s, i, 0, 0)),
                    pl.BlockSpec((pl.Squeezed(), pl.Squeezed(), 1, Cp),
                                 lambda s, i, k: (s, i, 0, 0)),
                ],
                scratch_shapes=[pltpu.VMEM((tm, Cp), jnp.float32)],
            ),
            compiler_params=pltpu.CompilerParams(
                dimension_semantics=("parallel", "parallel", "arbitrary"),
                vmem_limit_bytes=matmul_vmem),
        )(a, b)

    # --- tiny glue: global batch stats -> per-channel scale / shift ---
    # (E[x^2]-E[x]^2 in f32: fine for typical BN activations / batch sizes)
    count = jnp.float32(N * OH * OW)
    mean = jnp.sum(s1p, axis=(0, 1, 2)) / count
    var = jnp.maximum(jnp.sum(s2p, axis=(0, 1, 2)) / count - mean * mean, 0.0)
    inv = jax.lax.rsqrt(var + BN_EPS)
    gamma_p = jnp.pad(gamma.astype(jnp.float32), (0, Cp - Co))
    beta_p = jnp.pad(beta.astype(jnp.float32), (0, Cp - Co))
    scale = (gamma_p * inv).reshape(1, Cp)
    shift = (beta_p - mean * gamma_p * inv).reshape(1, Cp)

    # --- Pallas pass 2: tiled BN-apply + ReLU, bf16 output, fully parallel grid ---
    out_flat = pl.pallas_call(
        _bn_relu_kernel,
        out_shape=jax.ShapeDtypeStruct((4, M, Cp), jnp.bfloat16),
        grid_spec=pltpu.PrefetchScalarGridSpec(
            num_scalar_prefetch=0,
            grid=(4, n_m),
            in_specs=[
                pl.BlockSpec((pl.Squeezed(), tm, Cp), lambda s, i: (s, i, 0)),
                pl.BlockSpec((1, Cp), lambda s, i: (0, 0)),
                pl.BlockSpec((1, Cp), lambda s, i: (0, 0)),
            ],
            out_specs=pl.BlockSpec((pl.Squeezed(), tm, Cp), lambda s, i: (s, i, 0)),
        ),
        compiler_params=pltpu.CompilerParams(
            dimension_semantics=("parallel", "parallel"),
            vmem_limit_bytes=_vmem_limit(_bn_footprint(tm, Cp))),
    )(y, scale, shift)

    # TODO(synk): the stride-2 parity interleave into NCHW has no rectangular
    # BlockSpec form; it remains a single fused XLA pass (bf16 read -> f32 write)
    # that also absorbs the Co slice and the dtype cast.
    out = out_flat[:, :, :Co].reshape(2, 2, N, H, W, Co)
    out = out.transpose(2, 5, 3, 0, 4, 1).reshape(N, Co, OH, OW)
    return out.astype(jnp.float32)


# ------------------------- pure-JAX reference -------------------------

def upconv_reference(x, w, gamma, beta):
    w_ref = jnp.transpose(w[:, :, ::-1, ::-1], (1, 0, 2, 3))   # (Co, Ci, KH, KW)
    y = jax.lax.conv_general_dilated(
        x, w_ref, window_strides=(1, 1),
        padding=[(KH - 1 - PAD, KH - 1 - PAD), (KW - 1 - PAD, KW - 1 - PAD)],
        lhs_dilation=(STRIDE, STRIDE),
        dimension_numbers=('NCHW', 'OIHW', 'NCHW'),
        precision=jax.lax.Precision.HIGHEST)
    mean = y.mean(axis=(0, 2, 3), keepdims=True)
    var = ((y - mean) ** 2).mean(axis=(0, 2, 3), keepdims=True)  # biased
    yhat = (y - mean) * jax.lax.rsqrt(var + BN_EPS)
    out = yhat * gamma.reshape(1, -1, 1, 1) + beta.reshape(1, -1, 1, 1)
    return jnp.maximum(out, 0.0)


if __name__ == "__main__":
    key = jax.random.PRNGKey(0)
    k1, k2, k3, k4 = jax.random.split(key, 4)

    N, Cin, Cout, H, W = 2, 4, 8, 16, 16          # output spatial = 32x32
    x = jax.random.normal(k1, (N, Cin, H, W), jnp.float32)
    # ConvTranspose2d weight: (in_channels, out_channels, KH, KW), no bias
    fan = Cin * KH * KW
    wt = jax.random.uniform(k2, (Cin, Cout, KH, KW), jnp.float32,
                            minval=-1.0, maxval=1.0) / np.sqrt(fan)
    gamma = 1.0 + 0.1 * jax.random.normal(k3, (Cout,), jnp.float32)
    beta = 0.1 * jax.random.normal(k4, (Cout,), jnp.float32)

    fwd = jax.jit(upconv_forward)
    out = jax.block_until_ready(fwd(x, wt, gamma, beta))

    # Reference with bf16-rounded operands (the kernel feeds the MXU bf16 with
    # f32 accumulation); tolerance covers the bf16 y and bf16 BN-output round trips.
    x_r = x.astype(jnp.bfloat16).astype(jnp.float32)
    w_r = wt.astype(jnp.bfloat16).astype(jnp.float32)
    ref = jax.block_until_ready(upconv_reference(x_r, w_r, gamma, beta))

    assert out.shape == (N, Cout, STRIDE * H, STRIDE * W), out.shape
    np.testing.assert_allclose(np.asarray(out), np.asarray(ref),
                               rtol=1e-2, atol=2e-2)
    print("KERNEL_OK")
</pallas_src>

<mosaic_0001>
module attributes {stable_mosaic.version = 11 : i64} {
  func.func @_matmul_stats_kernel_1k(%arg0: i32, %arg1: i32, %arg2: memref<1x512x16xbf16, #tpu.memory_space<vmem>>, %arg3: memref<1x16x128xbf16, #tpu.memory_space<vmem>>, %arg4: memref<1x512x128xbf16, #tpu.memory_space<vmem>>, %arg5: memref<1x1x1x128xf32, #tpu.memory_space<vmem>>, %arg6: memref<1x1x1x128xf32, #tpu.memory_space<vmem>>) attributes {dimension_semantics = [#tpu.dimension_semantics<parallel>, #tpu.dimension_semantics<parallel>], iteration_bounds = array<i64: 4, 1>, scalar_prefetch = 0 : i64, scratch_operands = 0 : i64, tpu.core_type = #tpu.core_type<tc>, window_params = [{transform_indices = @transform_0, window_bounds = array<i64: 1, 512, 16>}, {transform_indices = @transform_1, window_bounds = array<i64: 1, 16, 128>}, {transform_indices = @transform_2, window_bounds = array<i64: 1, 512, 128>}, {transform_indices = @transform_3, window_bounds = array<i64: 1, 1, 1, 128>}, {transform_indices = @transform_4, window_bounds = array<i64: 1, 1, 1, 128>}]} {
    %c0 = arith.constant 0 : index
    %c0_0 = arith.constant 0 : index
    %c0_1 = arith.constant 0 : index
    %0 = vector.load %arg2[%c0, %c0_0, %c0_1] : memref<1x512x16xbf16, #tpu.memory_space<vmem>>, vector<1x512x16xbf16>
    %1 = vector.shape_cast %0 : vector<1x512x16xbf16> to vector<512x16xbf16>
    %c0_2 = arith.constant 0 : index
    %c0_3 = arith.constant 0 : index
    %c0_4 = arith.constant 0 : index
    %2 = vector.load %arg3[%c0_2, %c0_3, %c0_4] : memref<1x16x128xbf16, #tpu.memory_space<vmem>>, vector<1x16x128xbf16>
    %3 = vector.shape_cast %2 : vector<1x16x128xbf16> to vector<16x128xbf16>
    %cst = arith.constant dense<0.000000e+00> : vector<512x128xf32>
    %4 = tpu.matmul %1, %3, %cst {dimension_numbers = #tpu.dot_dimension_numbers<[1], [0], [0], [1], [0, 0, 1, 1], [], []>} : vector<512x16xbf16>, vector<16x128xbf16>, vector<512x128xf32> -> vector<512x128xf32>
    %5 = arith.truncf %4 : vector<512x128xf32> to vector<512x128xbf16>
    %c0_5 = arith.constant 0 : index
    %c0_6 = arith.constant 0 : index
    %c0_7 = arith.constant 0 : index
    %6 = vector.load %arg4[%c0_5, %c0_6, %c0_7] : memref<1x512x128xbf16, #tpu.memory_space<vmem>>, vector<1x512x128xbf16>
    %7 = vector.shape_cast %6 : vector<1x512x128xbf16> to vector<512x128xbf16>
    %8 = vector.shape_cast %5 : vector<512x128xbf16> to vector<1x512x128xbf16>
    tpu.vector_store %arg4[%c0_5, %c0_6, %c0_7], %8 {strides = array<i32>} : memref<1x512x128xbf16, #tpu.memory_space<vmem>>, vector<1x512x128xbf16>,
    %cst_8 = arith.constant dense<0.000000e+00> : vector<128xf32>
    %9 = vector.multi_reduction <add>, %4, %cst_8 [0] : vector<512x128xf32> to vector<128xf32>
    %10 = vector.shape_cast %9 : vector<128xf32> to vector<1x128xf32>
    %c0_9 = arith.constant 0 : index
    %c0_10 = arith.constant 0 : index
    %c0_11 = arith.constant 0 : index
    %c0_12 = arith.constant 0 : index
    %11 = vector.load %arg5[%c0_9, %c0_10, %c0_11, %c0_12] : memref<1x1x1x128xf32, #tpu.memory_space<vmem>>, vector<1x1x1x128xf32>
    %12 = vector.shape_cast %11 : vector<1x1x1x128xf32> to vector<1x128xf32>
    %13 = vector.shape_cast %10 : vector<1x128xf32> to vector<1x1x1x128xf32>
    tpu.vector_store %arg5[%c0_9, %c0_10, %c0_11, %c0_12], %13 {strides = array<i32>} : memref<1x1x1x128xf32, #tpu.memory_space<vmem>>, vector<1x1x1x128xf32>,
    %14 = arith.mulf %4, %4 : vector<512x128xf32>
    %cst_13 = arith.constant dense<0.000000e+00> : vector<128xf32>
    %15 = vector.multi_reduction <add>, %14, %cst_13 [0] : vector<512x128xf32> to vector<128xf32>
    %16 = vector.shape_cast %15 : vector<128xf32> to vector<1x128xf32>
    %c0_14 = arith.constant 0 : index
    %c0_15 = arith.constant 0 : index
    %c0_16 = arith.constant 0 : index
    %c0_17 = arith.constant 0 : index
    %17 = vector.load %arg6[%c0_14, %c0_15, %c0_16, %c0_17] : memref<1x1x1x128xf32, #tpu.memory_space<vmem>>, vector<1x1x1x128xf32>
    %18 = vector.shape_cast %17 : vector<1x1x1x128xf32> to vector<1x128xf32>
    %19 = vector.shape_cast %16 : vector<1x128xf32> to vector<1x1x1x128xf32>
    tpu.vector_store %arg6[%c0_14, %c0_15, %c0_16, %c0_17], %19 {strides = array<i32>} : memref<1x1x1x128xf32, #tpu.memory_space<vmem>>, vector<1x1x1x128xf32>,
    return
  }
  func.func @transform_0(%arg0: i32, %arg1: i32) -> (i32, i32, i32) {
    %c0_i32 = arith.constant 0 : i32
    %c0_i32_0 = arith.constant 0 : i32
    return %arg0, %arg1, %c0_i32 : i32, i32, i32
  }
  func.func @transform_1(%arg0: i32, %arg1: i32) -> (i32, i32, i32) {
    %c0_i32 = arith.constant 0 : i32
    %c0_i32_0 = arith.constant 0 : i32
    %c0_i32_1 = arith.constant 0 : i32
    return %arg0, %c0_i32, %c0_i32_0 : i32, i32, i32
  }
  func.func @transform_2(%arg0: i32, %arg1: i32) -> (i32, i32, i32) {
    %c0_i32 = arith.constant 0 : i32
    %c0_i32_0 = arith.constant 0 : i32
    return %arg0, %arg1, %c0_i32 : i32, i32, i32
  }
  func.func @transform_3(%arg0: i32, %arg1: i32) -> (i32, i32, i32, i32) {
    %c0_i32 = arith.constant 0 : i32
    %c0_i32_0 = arith.constant 0 : i32
    %c0_i32_1 = arith.constant 0 : i32
    return %arg0, %arg1, %c0_i32, %c0_i32_0 : i32, i32, i32, i32
  }
  func.func @transform_4(%arg0: i32, %arg1: i32) -> (i32, i32, i32, i32) {
    %c0_i32 = arith.constant 0 : i32
    %c0_i32_0 = arith.constant 0 : i32
    %c0_i32_1 = arith.constant 0 : i32
    return %arg0, %arg1, %c0_i32, %c0_i32_0 : i32, i32, i32, i32
  }
}

module attributes {stable_mosaic.version = 11 : i64} {
  func.func @_bn_relu_kernel(%arg0: i32, %arg1: i32, %arg2: memref<1x512x128xbf16, #tpu.memory_space<vmem>>, %arg3: memref<1x128xf32, #tpu.memory_space<vmem>>, %arg4: memref<1x128xf32, #tpu.memory_space<vmem>>, %arg5: memref<1x512x128xbf16, #tpu.memory_space<vmem>>) attributes {dimension_semantics = [#tpu.dimension_semantics<parallel>, #tpu.dimension_semantics<parallel>], iteration_bounds = array<i64: 4, 1>, scalar_prefetch = 0 : i64, scratch_operands = 0 : i64, tpu.core_type = #tpu.core_type<tc>, window_params = [{transform_indices = @transform_0, window_bounds = array<i64: 1, 512, 128>}, {pipeline_mode = #tpu.pipeline_mode<synchronous>, transform_indices = @transform_1, window_bounds = array<i64: 1, 128>}, {pipeline_mode = #tpu.pipeline_mode<synchronous>, transform_indices = @transform_2, window_bounds = array<i64: 1, 128>}, {transform_indices = @transform_3, window_bounds = array<i64: 1, 512, 128>}]} {
    %c0 = arith.constant 0 : index
    %c0_0 = arith.constant 0 : index
    %c0_1 = arith.constant 0 : index
    %0 = vector.load %arg2[%c0, %c0_0, %c0_1] : memref<1x512x128xbf16, #tpu.memory_space<vmem>>, vector<1x512x128xbf16>
    %1 = vector.shape_cast %0 : vector<1x512x128xbf16> to vector<512x128xbf16>
    %2 = arith.extf %1 : vector<512x128xbf16> to vector<512x128xf32>
    %c0_2 = arith.constant 0 : index
    %c0_3 = arith.constant 0 : index
    %3 = vector.load %arg3[%c0_2, %c0_3] : memref<1x128xf32, #tpu.memory_space<vmem>>, vector<1x128xf32>
    %4 = vector.broadcast %3 : vector<1x128xf32> to vector<512x128xf32>
    %5 = arith.mulf %2, %4 : vector<512x128xf32>
    %c0_4 = arith.constant 0 : index
    %c0_5 = arith.constant 0 : index
    %6 = vector.load %arg4[%c0_4, %c0_5] : memref<1x128xf32, #tpu.memory_space<vmem>>, vector<1x128xf32>
    %7 = vector.broadcast %6 : vector<1x128xf32> to vector<512x128xf32>
    %8 = arith.addf %5, %7 : vector<512x128xf32>
    %cst = arith.constant 0.000000e+00 : f32
    %9 = vector.broadcast %cst : f32 to vector<512x128xf32>
    %10 = arith.maximumf %8, %9 : vector<512x128xf32>
    %11 = arith.truncf %10 : vector<512x128xf32> to vector<512x128xbf16>
    %c0_6 = arith.constant 0 : index
    %c0_7 = arith.constant 0 : index
    %c0_8 = arith.constant 0 : index
    %12 = vector.load %arg5[%c0_6, %c0_7, %c0_8] : memref<1x512x128xbf16, #tpu.memory_space<vmem>>, vector<1x512x128xbf16>
    %13 = vector.shape_cast %12 : vector<1x512x128xbf16> to vector<512x128xbf16>
    %14 = vector.shape_cast %11 : vector<512x128xbf16> to vector<1x512x128xbf16>
    tpu.vector_store %arg5[%c0_6, %c0_7, %c0_8], %14 {strides = array<i32>} : memref<1x512x128xbf16, #tpu.memory_space<vmem>>, vector<1x512x128xbf16>,
    return
  }
  func.func @transform_0(%arg0: i32, %arg1: i32) -> (i32, i32, i32) {
    %c0_i32 = arith.constant 0 : i32
    %c0_i32_0 = arith.constant 0 : i32
    return %arg0, %arg1, %c0_i32 : i32, i32, i32
  }
  func.func @transform_1(%arg0: i32, %arg1: i32) -> (i32, i32) {
    %c0_i32 = arith.constant 0 : i32
    %c0_i32_0 = arith.constant 0 : i32
    %c0_i32_1 = arith.constant 0 : i32
    return %c0_i32, %c0_i32_0 : i32, i32
  }
  func.func @transform_2(%arg0: i32, %arg1: i32) -> (i32, i32) {
    %c0_i32 = arith.constant 0 : i32
    %c0_i32_0 = arith.constant 0 : i32
    %c0_i32_1 = arith.constant 0 : i32
    return %c0_i32, %c0_i32_0 : i32, i32
  }
  func.func @transform_3(%arg0: i32, %arg1: i32) -> (i32, i32, i32) {
    %c0_i32 = arith.constant 0 : i32
    %c0_i32_0 = arith.constant 0 : i32
    return %arg0, %arg1, %c0_i32 : i32, i32, i32
  }
}

</mosaic_0001>

<bundles_post_ra>
// kernel: upconv_forward.3
= control target key start
LH: loop header
LB: loop body
LE: loop exit
PB: predicated region body
PF: predicated region fallthrough
CT: control target
= control target key end

     0   :  { %s1186_s12 = smov 0   ;;  %s1188_s13 = smov 0   ;;  %s1432_s0 = inlined_call_operand.vmem [shape: bf16[4,512,128], index: 0, kind: input, shape index: {}]   ;;  %s1433_s1 = inlined_call_operand.vmem [shape: f32[1,128], index: 1, kind: input, shape index: {}]   ;;  %s1434_s2 = inlined_call_operand.vmem [shape: f32[1,128], index: 2, kind: input, shape index: {}]   ;;  %s1435_s3 = inlined_call_operand.vmem [shape: bf16[4,512,128], index: 3, kind: output, shape index: {}]  }
   0x1   :  { %s1190_s14 = smov 0  }
   0x2 LB: > { %s25_s15 = sadd.s32 1, %s1160_s13  ;;  %p757_p0 = scmp.ge.s32.totalorder %s1164_s14, 1  ;;  %s1164_s14 = sphi %s1190_s14, %s13_s14   ;;  %s1160_s13 = sphi %s1188_s13, %s1437_s13   ;;  %s1156_s12 = sphi %s1186_s12, %s1436_s12  }
   0x3   : > { %p27_p1 = scmp.ge.s32.totalorder %s25_s15, 4  ;;  %p158_p2 = scmp.lt.s32.totalorder %s1164_s14, 5 }
   0x5   : > { %s1439_s15 = smov (%p27_p1, %s25_s15), 0  ;;  %p159_p3 = pnand %p757_p0, %p158_p2 }
   0x6   : > { %p191_p4 = scmp.lt.s32.totalorder (!%p159_p3), %s1156_s12, 3 }
   0x7   : > { %162 = sbr.rel (%p159_p3) target bundleno = 94 (0x5e), region = 32 }
   0xc   : > { %s1441_s12 = smov (!%p191_p4, %s1156_s12), 3  ;;  %v1217_v0 = vld [vmem:[%s1433_s1] ss:$0 sm:$0xff] }
   0xd   : > { %s764_s16 = sshll.u32 %s1441_s12, 8  ;;  %v1225_v6 = vld [vmem:[%s1434_s2] ss:$0 sm:$0xff] }
   0xe   : > { %s1212_s19 = scalar_lea.vmem %s1432_s0, %s764_s16  ;;  %s1251_s26 = scalar_lea.vmem %s1435_s3, %s764_s16 }
   0xf   : > { %v767_v1 = vld [vmem:[%s1212_s19] sm:$0xff]   ;;  %v1054_v2 = vld [vmem:[%s1212_s19 + $0x8] sm:$0xff]   ;;  %v1055_v3 = vld [vmem:[%s1212_s19 + $0x10] sm:$0xff]  }
  0x10   : > { %v768_v4 = vunpack.c.l.bf16 %v767_v1  ;;  %v769_v5 = vunpack.c.h.bf16 %v767_v1  ;;  %v772_v7 = vunpack.c.l.bf16 %v1054_v2  ;;  %v773_v8 = vunpack.c.h.bf16 %v1054_v2  ;;  %v1056_v9 = vld [vmem:[%s1212_s19 + $0x18] sm:$0xff]   ;;  %v1057_v30 = vld [vmem:[%s1212_s19 + $0x20] sm:$0xff]   ;;  %v1058_v35 = vld [vmem:[%s1212_s19 + $0x28] sm:$0xff]  }
  0x11   : > { %v776_v10 = vunpack.c.l.bf16 %v1055_v3  ;;  %v777_v11 = vunpack.c.h.bf16 %v1055_v3  ;;  %v780_v12 = vunpack.c.l.bf16 %v1056_v9  ;;  %v781_v13 = vunpack.c.h.bf16 %v1056_v9  ;;  %v1059_v40 = vld [vmem:[%s1212_s19 + $0x30] sm:$0xff]   ;;  %v1060_v45 = vld [vmem:[%s1212_s19 + $0x38] sm:$0xff]   ;;  %v1061_v3 = vld [vmem:[%s1212_s19 + $0x40] sm:$0xff]  }
  0x12   : > { %v342_v14 = vmul.f32 %v1217_v0, %v768_v4  ;;  %v343_v15 = vmul.f32 %v1217_v0, %v769_v5  ;;  %v344_v16 = vmul.f32 %v1217_v0, %v772_v7  ;;  %v345_v17 = vmul.f32 %v1217_v0, %v773_v8 }
  0x13   : > { %v346_v18 = vmul.f32 %v1217_v0, %v776_v10  ;;  %v347_v19 = vmul.f32 %v1217_v0, %v777_v11  ;;  %v348_v20 = vmul.f32 %v1217_v0, %v780_v12  ;;  %v349_v21 = vmul.f32 %v1217_v0, %v781_v13  ;;  %v1062_v13 = vld [vmem:[%s1212_s19 + $0x48] sm:$0xff]  }
  0x14   : > { %v410_v22 = vadd.f32 %v1225_v6, %v342_v14  ;;  %v411_v23 = vadd.f32 %v1225_v6, %v343_v15  ;;  %v412_v24 = vadd.f32 %v1225_v6, %v344_v16  ;;  %v413_v25 = vadd.f32 %v1225_v6, %v345_v17 }
  0x15   : > { %v414_v26 = vadd.f32 %v1225_v6, %v346_v18  ;;  %v415_v27 = vadd.f32 %v1225_v6, %v347_v19  ;;  %v416_v28 = vadd.f32 %v1225_v6, %v348_v20  ;;  %v417_v29 = vadd.f32 %v1225_v6, %v349_v21  ;;  %v1063_v18 = vld [vmem:[%s1212_s19 + $0x50] sm:$0xff]  }
  0x16   : > { %v474_v31 = vmax.f32 %v410_v22, 0.0  ;;  %v475_v32 = vmax.f32 %v411_v23, 0.0  ;;  %v476_v33 = vmax.f32 %v412_v24, 0.0  ;;  %v477_v34 = vmax.f32 %v413_v25, 0.0  ;;  %v1064_v23 = vld [vmem:[%s1212_s19 + $0x58] sm:$0xff]  }
  0x17   : > { %v478_v36 = vmax.f32 %v414_v26, 0.0  ;;  %v479_v37 = vmax.f32 %v415_v27, 0.0  ;;  %v480_v38 = vmax.f32 %v416_v28, 0.0  ;;  %v481_v39 = vmax.f32 %v417_v29, 0.0 }
  0x18   : > { %v897_v41 = vpack.c.bf16 %v475_v32, %v474_v31  ;;  %v902_v42 = vpack.c.bf16 %v477_v34, %v476_v33  ;;  %v784_v43 = vunpack.c.l.bf16 %v1057_v30  ;;  %v785_v44 = vunpack.c.h.bf16 %v1057_v30 }
  0x19   : > { %v907_v46 = vpack.c.bf16 %v479_v37, %v478_v36  ;;  %v912_v47 = vpack.c.bf16 %v481_v39, %v480_v38  ;;  %v788_v48 = vunpack.c.l.bf16 %v1058_v35  ;;  %v789_v49 = vunpack.c.h.bf16 %v1058_v35 }
  0x1a   : > { %898 = vst [vmem:[%s1251_s26] sm:$0xff] %v897_v41   ;;  %v350_v50 = vmul.f32 %v1217_v0, %v784_v43  ;;  %v351_v51 = vmul.f32 %v1217_v0, %v785_v44  ;;  %v792_v52 = vunpack.c.l.bf16 %v1059_v40  ;;  %v793_v53 = vunpack.c.h.bf16 %v1059_v40  ;;  %v1065_v40 = vld [vmem:[%s1212_s19 + $0x60] sm:$0xff]  }
  0x1b   : > { %1085 = vst [vmem:[%s1251_s26 + $0x8] sm:$0xff] %v902_v42   ;;  %v352_v54 = vmul.f32 %v1217_v0, %v788_v48  ;;  %v353_v55 = vmul.f32 %v1217_v0, %v789_v49  ;;  %v796_v56 = vunpack.c.l.bf16 %v1060_v45  ;;  %v797_v57 = vunpack.c.h.bf16 %v1060_v45 }
  0x1c   : > { %1086 = vst [vmem:[%s1251_s26 + $0x10] sm:$0xff] %v907_v46   ;;  %v418_v58 = vadd.f32 %v1225_v6, %v350_v50  ;;  %v419_v59 = vadd.f32 %v1225_v6, %v351_v51  ;;  %v354_v60 = vmul.f32 %v1217_v0, %v792_v52  ;;  %v355_v61 = vmul.f32 %v1217_v0, %v793_v53  ;;  %v1066_v53 = vld [vmem:[%s1212_s19 + $0x68] sm:$0xff]  }
  0x1d   : > { %1087 = vst [vmem:[%s1251_s26 + $0x18] sm:$0xff] %v912_v47   ;;  %v420_v62 = vadd.f32 %v1225_v6, %v352_v54  ;;  %v421_v63 = vadd.f32 %v1225_v6, %v353_v55  ;;  %v356_v1 = vmul.f32 %v1217_v0, %v796_v56  ;;  %v357_v2 = vmul.f32 %v1217_v0, %v797_v57 }
  0x1e   : > { %v482_v4 = vmax.f32 %v418_v58, 0.0  ;;  %v483_v5 = vmax.f32 %v419_v59, 0.0  ;;  %v422_v7 = vadd.f32 %v1225_v6, %v354_v60  ;;  %v423_v8 = vadd.f32 %v1225_v6, %v355_v61  ;;  %v1067_v58 = vld [vmem:[%s1212_s19 + $0x70] sm:$0xff]  }
  0x1f   : > { %v484_v9 = vmax.f32 %v420_v62, 0.0  ;;  %v485_v10 = vmax.f32 %v421_v63, 0.0  ;;  %v424_v11 = vadd.f32 %v1225_v6, %v356_v1  ;;  %v425_v12 = vadd.f32 %v1225_v6, %v357_v2  ;;  %v1068_v63 = vld [vmem:[%s1212_s19 + $0x78] sm:$0xff]  }
  0x20   : > { %v917_v14 = vpack.c.bf16 %v483_v5, %v482_v4  ;;  %v486_v15 = vmax.f32 %v422_v7, 0.0  ;;  %v487_v16 = vmax.f32 %v423_v8, 0.0  ;;  %v800_v17 = vunpack.c.l.bf16 %v1061_v3 }
  0x21   : > { %v922_v19 = vpack.c.bf16 %v485_v10, %v484_v9  ;;  %v488_v20 = vmax.f32 %v424_v11, 0.0  ;;  %v489_v21 = vmax.f32 %v425_v12, 0.0  ;;  %v801_v22 = vunpack.c.h.bf16 %v1061_v3 }
  0x22   : > { %1088 = vst [vmem:[%s1251_s26 + $0x20] sm:$0xff] %v917_v14   ;;  %v927_v24 = vpack.c.bf16 %v487_v16, %v486_v15  ;;  %v358_v25 = vmul.f32 %v1217_v0, %v800_v17  ;;  %v804_v26 = vunpack.c.l.bf16 %v1062_v13  ;;  %v805_v27 = vunpack.c.h.bf16 %v1062_v13  ;;  %v1069_v14 = vld [vmem:[%s1212_s19 + $0x80] sm:$0xff]  }
  0x23   : > { %1089 = vst [vmem:[%s1251_s26 + $0x28] sm:$0xff] %v922_v19   ;;  %v932_v28 = vpack.c.bf16 %v489_v21, %v488_v20  ;;  %v359_v29 = vmul.f32 %v1217_v0, %v801_v22  ;;  %v808_v30 = vunpack.c.l.bf16 %v1063_v18  ;;  %v809_v31 = vunpack.c.h.bf16 %v1063_v18 }
  0x24   : > { %1090 = vst [vmem:[%s1251_s26 + $0x30] sm:$0xff] %v927_v24   ;;  %v426_v32 = vadd.f32 %v1225_v6, %v358_v25  ;;  %v360_v33 = vmul.f32 %v1217_v0, %v804_v26  ;;  %v361_v34 = vmul.f32 %v1217_v0, %v805_v27  ;;  %v812_v35 = vunpack.c.l.bf16 %v1064_v23 }
  0x25   : > { %1091 = vst [vmem:[%s1251_s26 + $0x38] sm:$0xff] %v932_v28   ;;  %v427_v36 = vadd.f32 %v1225_v6, %v359_v29  ;;  %v362_v37 = vmul.f32 %v1217_v0, %v808_v30  ;;  %v363_v38 = vmul.f32 %v1217_v0, %v809_v31  ;;  %v813_v39 = vunpack.c.h.bf16 %v1064_v23  ;;  %v1070_v31 = vld [vmem:[%s1212_s19 + $0x88] sm:$0xff]  }
  0x26   : > { %v490_v41 = vmax.f32 %v426_v32, 0.0  ;;  %v428_v42 = vadd.f32 %v1225_v6, %v360_v33  ;;  %v429_v43 = vadd.f32 %v1225_v6, %v361_v34  ;;  %v364_v44 = vmul.f32 %v1217_v0, %v812_v35 }
  0x27   : > { %v491_v45 = vmax.f32 %v427_v36, 0.0  ;;  %v430_v46 = vadd.f32 %v1225_v6, %v362_v37  ;;  %v431_v47 = vadd.f32 %v1225_v6, %v363_v38  ;;  %v365_v48 = vmul.f32 %v1217_v0, %v813_v39  ;;  %v1071_v36 = vld [vmem:[%s1212_s19 + $0x90] sm:$0xff]  }
  0x28   : > { %v492_v49 = vmax.f32 %v428_v42, 0.0  ;;  %v493_v50 = vmax.f32 %v429_v43, 0.0  ;;  %v432_v51 = vadd.f32 %v1225_v6, %v364_v44  ;;  %v816_v52 = vunpack.c.l.bf16 %v1065_v40 }
  0x29   : > { %v937_v54 = vpack.c.bf16 %v491_v45, %v490_v41  ;;  %v494_v55 = vmax.f32 %v430_v46, 0.0  ;;  %v495_v56 = vmax.f32 %v431_v47, 0.0  ;;  %v433_v57 = vadd.f32 %v1225_v6, %v365_v48  ;;  %v1072_v41 = vld [vmem:[%s1212_s19 + $0x98] sm:$0xff]  }
  0x2a   : > { %v942_v59 = vpack.c.bf16 %v493_v50, %v492_v49  ;;  %v496_v60 = vmax.f32 %v432_v51, 0.0  ;;  %v817_v61 = vunpack.c.h.bf16 %v1065_v40  ;;  %v366_v62 = vmul.f32 %v1217_v0, %v816_v52 }
  0x2b   : > { %1092 = vst [vmem:[%s1251_s26 + $0x40] sm:$0xff] %v937_v54   ;;  %v947_v1 = vpack.c.bf16 %v495_v56, %v494_v55  ;;  %v497_v2 = vmax.f32 %v433_v57, 0.0  ;;  %v820_v3 = vunpack.c.l.bf16 %v1066_v53  ;;  %v821_v4 = vunpack.c.h.bf16 %v1066_v53  ;;  %v1073_v54 = vld [vmem:[%s1212_s19 + $0xa0] sm:$0xff]  }
  0x2c   : > { %1093 = vst [vmem:[%s1251_s26 + $0x48] sm:$0xff] %v942_v59   ;;  %v367_v5 = vmul.f32 %v1217_v0, %v817_v61  ;;  %v434_v7 = vadd.f32 %v1225_v6, %v366_v62  ;;  %v824_v8 = vunpack.c.l.bf16 %v1067_v58  ;;  %v825_v9 = vunpack.c.h.bf16 %v1067_v58 }
  0x2d   : > { %1094 = vst [vmem:[%s1251_s26 + $0x50] sm:$0xff] %v947_v1   ;;  %v952_v10 = vpack.c.bf16 %v497_v2, %v496_v60  ;;  %v368_v11 = vmul.f32 %v1217_v0, %v820_v3  ;;  %v369_v12 = vmul.f32 %v1217_v0, %v821_v4  ;;  %v828_v13 = vunpack.c.l.bf16 %v1068_v63  ;;  %v1074_v4 = vld [vmem:[%s1212_s19 + $0xa8] sm:$0xff]  }
  0x2e   : > { %v435_v15 = vadd.f32 %v1225_v6, %v367_v5  ;;  %v498_v16 = vmax.f32 %v434_v7, 0.0  ;;  %v370_v17 = vmul.f32 %v1217_v0, %v824_v8  ;;  %v371_v18 = vmul.f32 %v1217_v0, %v825_v9 }
  0x2f   : > { %1095 = vst [vmem:[%s1251_s26 + $0x58] sm:$0xff] %v952_v10   ;;  %v436_v19 = vadd.f32 %v1225_v6, %v368_v11  ;;  %v437_v20 = vadd.f32 %v1225_v6, %v369_v12  ;;  %v829_v21 = vunpack.c.h.bf16 %v1068_v63  ;;  %v372_v22 = vmul.f32 %v1217_v0, %v828_v13 }
  0x30   : > { %v499_v23 = vmax.f32 %v435_v15, 0.0  ;;  %v438_v24 = vadd.f32 %v1225_v6, %v370_v17  ;;  %v439_v25 = vadd.f32 %v1225_v6, %v371_v18  ;;  %v832_v26 = vunpack.c.l.bf16 %v1069_v14 }
  0x31   : > { %v500_v27 = vmax.f32 %v436_v19, 0.0  ;;  %v501_v28 = vmax.f32 %v437_v20, 0.0  ;;  %v373_v29 = vmul.f32 %v1217_v0, %v829_v21  ;;  %v440_v30 = vadd.f32 %v1225_v6, %v372_v22  ;;  %v1076_v19 = vld [vmem:[%s1212_s19 + $0xb8] sm:$0xff]  }
  0x32   : > { %v957_v32 = vpack.c.bf16 %v499_v23, %v498_v16  ;;  %v502_v33 = vmax.f32 %v438_v24, 0.0  ;;  %v503_v34 = vmax.f32 %v439_v25, 0.0  ;;  %v833_v35 = vunpack.c.h.bf16 %v1069_v14  ;;  %v1075_v14 = vld [vmem:[%s1212_s19 + $0xb0] sm:$0xff]  }
  0x33   : > { %v962_v37 = vpack.c.bf16 %v501_v28, %v500_v27  ;;  %v441_v38 = vadd.f32 %v1225_v6, %v373_v29  ;;  %v504_v39 = vmax.f32 %v440_v30, 0.0  ;;  %v374_v40 = vmul.f32 %v1217_v0, %v832_v26 }
  0x34   : > { %1096 = vst [vmem:[%s1251_s26 + $0x60] sm:$0xff] %v957_v32   ;;  %v967_v42 = vpack.c.bf16 %v503_v34, %v502_v33  ;;  %v375_v43 = vmul.f32 %v1217_v0, %v833_v35  ;;  %v836_v44 = vunpack.c.l.bf16 %v1070_v31  ;;  %v837_v45 = vunpack.c.h.bf16 %v1070_v31  ;;  %v1077_v32 = vld [vmem:[%s1212_s19 + $0xc0] sm:$0xff]  }
  0x35   : > { %1097 = vst [vmem:[%s1251_s26 + $0x68] sm:$0xff] %v962_v37   ;;  %v505_v46 = vmax.f32 %v441_v38, 0.0  ;;  %v442_v47 = vadd.f32 %v1225_v6, %v374_v40  ;;  %v840_v48 = vunpack.c.l.bf16 %v1071_v36  ;;  %v841_v49 = vunpack.c.h.bf16 %v1071_v36 }
  0x36   : > { %1098 = vst [vmem:[%s1251_s26 + $0x70] sm:$0xff] %v967_v42   ;;  %v443_v50 = vadd.f32 %v1225_v6, %v375_v43  ;;  %v376_v51 = vmul.f32 %v1217_v0, %v836_v44  ;;  %v377_v52 = vmul.f32 %v1217_v0, %v837_v45  ;;  %v844_v53 = vunpack.c.l.bf16 %v1072_v41  ;;  %v1078_v45 = vld [vmem:[%s1212_s19 + $0xc8] sm:$0xff]  }
  0x37   : > { %v972_v55 = vpack.c.bf16 %v505_v46, %v504_v39  ;;  %v506_v56 = vmax.f32 %v442_v47, 0.0  ;;  %v378_v57 = vmul.f32 %v1217_v0, %v840_v48  ;;  %v379_v58 = vmul.f32 %v1217_v0, %v841_v49 }
  0x38   : > { %v507_v59 = vmax.f32 %v443_v50, 0.0  ;;  %v444_v60 = vadd.f32 %v1225_v6, %v376_v51  ;;  %v445_v61 = vadd.f32 %v1225_v6, %v377_v52  ;;  %v845_v62 = vunpack.c.h.bf16 %v1072_v41 }
  0x39   : > { %1099 = vst [vmem:[%s1251_s26 + $0x78] sm:$0xff] %v972_v55   ;;  %v446_v63 = vadd.f32 %v1225_v6, %v378_v57  ;;  %v447_v1 = vadd.f32 %v1225_v6, %v379_v58  ;;  %v380_v2 = vmul.f32 %v1217_v0, %v844_v53  ;;  %v848_v3 = vunpack.c.l.bf16 %v1073_v54 }
  0x3a   : > { %v977_v5 = vpack.c.bf16 %v507_v59, %v506_v56  ;;  %v508_v7 = vmax.f32 %v444_v60, 0.0  ;;  %v509_v8 = vmax.f32 %v445_v61, 0.0  ;;  %v381_v9 = vmul.f32 %v1217_v0, %v845_v62 }
  0x3b   : > { %v510_v10 = vmax.f32 %v446_v63, 0.0  ;;  %v511_v11 = vmax.f32 %v447_v1, 0.0  ;;  %v448_v12 = vadd.f32 %v1225_v6, %v380_v2  ;;  %v849_v13 = vunpack.c.h.bf16 %v1073_v54  ;;  %v1079_v54 = vld [vmem:[%s1212_s19 + $0xd0] sm:$0xff]   ;;  %v1080_v63 = vld [vmem:[%s1212_s19 + $0xd8] sm:$0xff]  }
  0x3c   : > { %1100 = vst [vmem:[%s1251_s26 + $0x80] sm:$0xff] %v977_v5   ;;  %v982_v15 = vpack.c.bf16 %v509_v8, %v508_v7  ;;  %v449_v16 = vadd.f32 %v1225_v6, %v381_v9  ;;  %v382_v17 = vmul.f32 %v1217_v0, %v848_v3  ;;  %v852_v18 = vunpack.c.l.bf16 %v1074_v4 }
  0x3d   : > { %v987_v20 = vpack.c.bf16 %v511_v11, %v510_v10  ;;  %v512_v21 = vmax.f32 %v448_v12, 0.0  ;;  %v383_v22 = vmul.f32 %v1217_v0, %v849_v13  ;;  %v853_v23 = vunpack.c.h.bf16 %v1074_v4  ;;  %v1081_v10 = vld [vmem:[%s1212_s19 + $0xe0] sm:$0xff]  }
  0x3e   : > { %1101 = vst [vmem:[%s1251_s26 + $0x88] sm:$0xff] %v982_v15   ;;  %v513_v24 = vmax.f32 %v449_v16, 0.0  ;;  %v450_v25 = vadd.f32 %v1225_v6, %v382_v17  ;;  %v384_v26 = vmul.f32 %v1217_v0, %v852_v18  ;;  %v856_v27 = vunpack.c.l.bf16 %v1075_v14 }
  0x3f   : > { %1102 = vst [vmem:[%s1251_s26 + $0x90] sm:$0xff] %v987_v20   ;;  %v451_v28 = vadd.f32 %v1225_v6, %v383_v22  ;;  %v385_v29 = vmul.f32 %v1217_v0, %v853_v23  ;;  %v857_v30 = vunpack.c.h.bf16 %v1075_v14  ;;  %v860_v31 = vunpack.c.l.bf16 %v1076_v19  ;;  %v1082_v23 = vld [vmem:[%s1212_s19 + $0xe8] sm:$0xff]  }
  0x40   : > { %v992_v33 = vpack.c.bf16 %v513_v24, %v512_v21  ;;  %v514_v34 = vmax.f32 %v450_v25, 0.0  ;;  %v452_v35 = vadd.f32 %v1225_v6, %v384_v26  ;;  %v386_v36 = vmul.f32 %v1217_v0, %v856_v27 }
  0x41   : > { %v515_v37 = vmax.f32 %v451_v28, 0.0  ;;  %v453_v38 = vadd.f32 %v1225_v6, %v385_v29  ;;  %v387_v39 = vmul.f32 %v1217_v0, %v857_v30  ;;  %v861_v40 = vunpack.c.h.bf16 %v1076_v19 }
  0x42   : > { %1103 = vst [vmem:[%s1251_s26 + $0x98] sm:$0xff] %v992_v33   ;;  %v516_v41 = vmax.f32 %v452_v35, 0.0  ;;  %v454_v42 = vadd.f32 %v1225_v6, %v386_v36  ;;  %v388_v43 = vmul.f32 %v1217_v0, %v860_v31  ;;  %v864_v44 = vunpack.c.l.bf16 %v1077_v32 }
  0x43   : > { %v997_v46 = vpack.c.bf16 %v515_v37, %v514_v34  ;;  %v517_v47 = vmax.f32 %v453_v38, 0.0  ;;  %v455_v48 = vadd.f32 %v1225_v6, %v387_v39  ;;  %v389_v49 = vmul.f32 %v1217_v0, %v861_v40 }
  0x44   : > { %v518_v50 = vmax.f32 %v454_v42, 0.0  ;;  %v456_v51 = vadd.f32 %v1225_v6, %v388_v43  ;;  %v865_v52 = vunpack.c.h.bf16 %v1077_v32  ;;  %v390_v53 = vmul.f32 %v1217_v0, %v864_v44  ;;  %v1083_v32 = vld [vmem:[%s1212_s19 + $0xf0] sm:$0xff]  }
  0x45   : > { %1104 = vst [vmem:[%s1251_s26 + $0xa0] sm:$0xff] %v997_v46   ;;  %v1002_v55 = vpack.c.bf16 %v517_v47, %v516_v41  ;;  %v519_v56 = vmax.f32 %v455_v48, 0.0  ;;  %v457_v57 = vadd.f32 %v1225_v6, %v389_v49  ;;  %v868_v58 = vunpack.c.l.bf16 %v1078_v45  ;;  %v1084_v41 = vld [vmem:[%s1212_s19 + $0xf8] sm:$0xff]  }
  0x46   : > { %v520_v59 = vmax.f32 %v456_v51, 0.0  ;;  %v391_v60 = vmul.f32 %v1217_v0, %v865_v52  ;;  %v458_v61 = vadd.f32 %v1225_v6, %v390_v53  ;;  %v869_v62 = vunpack.c.h.bf16 %v1078_v45 }
  0x47   : > { %1105 = vst [vmem:[%s1251_s26 + $0xa8] sm:$0xff] %v1002_v55   ;;  %v1007_v1 = vpack.c.bf16 %v519_v56, %v518_v50  ;;  %v521_v2 = vmax.f32 %v457_v57, 0.0  ;;  %v392_v3 = vmul.f32 %v1217_v0, %v868_v58  ;;  %v872_v4 = vunpack.c.l.bf16 %v1079_v54 }
  0x48   : > { %v459_v5 = vadd.f32 %v1225_v6, %v391_v60  ;;  %v522_v7 = vmax.f32 %v458_v61, 0.0  ;;  %v393_v8 = vmul.f32 %v1217_v0, %v869_v62  ;;  %v873_v9 = vunpack.c.h.bf16 %v1079_v54 }
  0x49   : > { %1106 = vst [vmem:[%s1251_s26 + $0xb0] sm:$0xff] %v1007_v1   ;;  %v1012_v11 = vpack.c.bf16 %v521_v2, %v520_v59  ;;  %v460_v12 = vadd.f32 %v1225_v6, %v392_v3  ;;  %v394_v13 = vmul.f32 %v1217_v0, %v872_v4  ;;  %v876_v14 = vunpack.c.l.bf16 %v1080_v63 }
  0x4a   : > { %v523_v15 = vmax.f32 %v459_v5, 0.0  ;;  %v461_v16 = vadd.f32 %v1225_v6, %v393_v8  ;;  %v395_v17 = vmul.f32 %v1217_v0, %v873_v9  ;;  %v877_v18 = vunpack.c.h.bf16 %v1080_v63 }
  0x4b   : > { %1107 = vst [vmem:[%s1251_s26 + $0xb8] sm:$0xff] %v1012_v11   ;;  %v524_v19 = vmax.f32 %v460_v12, 0.0  ;;  %v462_v20 = vadd.f32 %v1225_v6, %v394_v13  ;;  %v396_v21 = vmul.f32 %v1217_v0, %v876_v14  ;;  %v880_v22 = vunpack.c.l.bf16 %v1081_v10 }
  0x4c   : > { %v1017_v24 = vpack.c.bf16 %v523_v15, %v522_v7  ;;  %v525_v25 = vmax.f32 %v461_v16, 0.0  ;;  %v463_v26 = vadd.f32 %v1225_v6, %v395_v17  ;;  %v397_v27 = vmul.f32 %v1217_v0, %v877_v18 }
  0x4d   : > { %v526_v28 = vmax.f32 %v462_v20, 0.0  ;;  %v464_v29 = vadd.f32 %v1225_v6, %v396_v21  ;;  %v881_v30 = vunpack.c.h.bf16 %v1081_v10  ;;  %v398_v31 = vmul.f32 %v1217_v0, %v880_v22 }
  0x4e   : > { %1108 = vst [vmem:[%s1251_s26 + $0xc0] sm:$0xff] %v1017_v24   ;;  %v1022_v33 = vpack.c.bf16 %v525_v25, %v524_v19  ;;  %v527_v34 = vmax.f32 %v463_v26, 0.0  ;;  %v465_v35 = vadd.f32 %v1225_v6, %v397_v27  ;;  %v884_v36 = vunpack.c.l.bf16 %v1082_v23 }
  0x4f   : > { %v528_v37 = vmax.f32 %v464_v29, 0.0  ;;  %v399_v38 = vmul.f32 %v1217_v0, %v881_v30  ;;  %v466_v39 = vadd.f32 %v1225_v6, %v398_v31  ;;  %v885_v40 = vunpack.c.h.bf16 %v1082_v23 }
  0x50   : > { %1109 = vst [vmem:[%s1251_s26 + $0xc8] sm:$0xff] %v1022_v33   ;;  %v1027_v42 = vpack.c.bf16 %v527_v34, %v526_v28  ;;  %v529_v43 = vmax.f32 %v465_v35, 0.0  ;;  %v400_v44 = vmul.f32 %v1217_v0, %v884_v36  ;;  %v888_v45 = vunpack.c.l.bf16 %v1083_v32 }
  0x51   : > { %v467_v46 = vadd.f32 %v1225_v6, %v399_v38  ;;  %v530_v47 = vmax.f32 %v466_v39, 0.0  ;;  %v401_v48 = vmul.f32 %v1217_v0, %v885_v40  ;;  %v889_v49 = vunpack.c.h.bf16 %v1083_v32 }
  0x52   : > { %1110 = vst [vmem:[%s1251_s26 + $0xd0] sm:$0xff] %v1027_v42   ;;  %v1032_v50 = vpack.c.bf16 %v529_v43, %v528_v37  ;;  %v468_v51 = vadd.f32 %v1225_v6, %v400_v44  ;;  %v402_v52 = vmul.f32 %v1217_v0, %v888_v45  ;;  %v892_v53 = vunpack.c.l.bf16 %v1084_v41 }
  0x53   : > { %v531_v54 = vmax.f32 %v467_v46, 0.0  ;;  %v469_v55 = vadd.f32 %v1225_v6, %v401_v48  ;;  %v403_v56 = vmul.f32 %v1217_v0, %v889_v49  ;;  %v893_v57 = vunpack.c.h.bf16 %v1084_v41 }
  0x54   : > { %1111 = vst [vmem:[%s1251_s26 + $0xd8] sm:$0xff] %v1032_v50   ;;  %v532_v58 = vmax.f32 %v468_v51, 0.0  ;;  %v470_v59 = vadd.f32 %v1225_v6, %v402_v52  ;;  %v404_v60 = vmul.f32 %v1217_v0, %v892_v53 }
  0x55   : > { %v1037_v61 = vpack.c.bf16 %v531_v54, %v530_v47  ;;  %v533_v62 = vmax.f32 %v469_v55, 0.0  ;;  %v471_v63 = vadd.f32 %v1225_v6, %v403_v56  ;;  %v405_v1 = vmul.f32 %v1217_v0, %v893_v57 }
  0x56   : > { %v534_v2 = vmax.f32 %v470_v59, 0.0  ;;  %v472_v3 = vadd.f32 %v1225_v6, %v404_v60 }
  0x57   : > { %1112 = vst [vmem:[%s1251_s26 + $0xe0] sm:$0xff] %v1037_v61   ;;  %v1042_v4 = vpack.c.bf16 %v533_v62, %v532_v58  ;;  %v535_v5 = vmax.f32 %v471_v63, 0.0  ;;  %v473_v7 = vadd.f32 %v1225_v6, %v405_v1 }
  0x58   : > { %v536_v8 = vmax.f32 %v472_v3, 0.0 }
  0x59   : > { %1113 = vst [vmem:[%s1251_s26 + $0xe8] sm:$0xff] %v1042_v4   ;;  %v1047_v9 = vpack.c.bf16 %v535_v5, %v534_v2  ;;  %v537_v10 = vmax.f32 %v473_v7, 0.0 }
  0x5b   : > { %1114 = vst [vmem:[%s1251_s26 + $0xf0] sm:$0xff] %v1047_v9   ;;  %v1052_v11 = vpack.c.bf16 %v537_v10, %v536_v8 }
  0x5d   : > { %1115 = vst [vmem:[%s1251_s26 + $0xf8] sm:$0xff] %v1052_v11  }
  0x5e PF: > { %s13_s14 = sadd.s32 1, %s1164_s14   ;;  %s1436_s12 = smov %s1160_s13 }
  0x5f   : > { %p10_p5 = scmp.ge.s32.totalorder %s13_s14, 6   ;;  %s1437_s13 = smov %s1439_s15 }
  0x61   :  { %12 = sbr.rel (!%p10_p5) target bundleno = 2 (0x2), region = 62 }

// kernel: upconv_forward.2
= control target key start
LH: loop header
LB: loop body
LE: loop exit
PB: predicated region body
PF: predicated region fallthrough
CT: control target
= control target key end

     0   :  { %s1770_s15 = smov 0   ;;  %s1772_s16 = smov 0   ;;  %s2210_s0 = inlined_call_operand.vmem [shape: bf16[4,512,16], index: 0, kind: input, shape index: {}]   ;;  %s2211_s1 = inlined_call_operand.vmem [shape: bf16[4,16,128], index: 1, kind: input, shape index: {}]   ;;  %s2212_s2 = inlined_call_operand.vmem [shape: bf16[4,512,128], index: 2, kind: output, shape index: {0}]   ;;  %s2213_s3 = inlined_call_operand.vmem [shape: f32[4,1,1,128], index: 3, kind: output, shape index: {1}]   ;;  %s2214_s4 = inlined_call_operand.vmem [shape: f32[4,1,1,128], index: 4, kind: output, shape index: {2}]  }
   0x1   :  { %s1774_s17 = smov 0  }
   0x2 LB: > { %s27_s18 = sadd.s32 1, %s1739_s16  ;;  %p1294_p0 = scmp.ge.s32.totalorder %s1743_s17, 1  ;;  %s1743_s17 = sphi %s1774_s17, %s15_s17   ;;  %s1739_s16 = sphi %s1772_s16, %s2216_s16   ;;  %s1735_s15 = sphi %s1770_s15, %s2215_s15  }
   0x3   : > { %p29_p1 = scmp.ge.s32.totalorder %s27_s18, 4  ;;  %p202_p2 = scmp.lt.s32.totalorder %s1743_s17, 5 }
   0x5   : > { %s2218_s18 = smov (%p29_p1, %s27_s18), 0  ;;  %p203_p3 = pnand %p1294_p0, %p202_p2 }
   0x6   : > { %p254_p4 = scmp.lt.s32.totalorder (!%p203_p3), %s1735_s15, 3 }
   0x7   : > { %206 = sbr.rel (%p203_p3) target bundleno = 378 (0x17a), region = 28 }
   0xc   : > { %s2220_s15 = smov (!%p254_p4, %s1735_s15), 3  ;;  %vm523_vm0 = vcmask 130048  }
   0xd   : > { %s1467_s19 = sshll.u32 %s2220_s15, 8  ;;  %s1468_s20 = sshll.u32 %s2220_s15, 3 }
   0xe   : > { %s1797_s23 = scalar_lea.vmem %s2210_s0, %s1467_s19  ;;  %s267_s26 = scalar_lea.vmem %s2211_s1, %s1468_s20 }
   0xf   : > { %v1502_v0 = vld [vmem:[%s267_s26] sm:$0xff]  ;;  %v1471_v3 = vld [vmem:[%s1797_s23 + $0x8] sm:$0xff]  ;;  %v1472_v6 = vld [vmem:[%s1797_s23 + $0x10] sm:$0xff]  ;;  %s1869_s29 = scalar_lea.vmem %s2212_s2, %s1467_s19  ;;  %s283_s6 = scalar_lea.vmem %s2213_s3, %s2220_s15 }
  0x10   : > { %v1470_v1 = vld [vmem:[%s1797_s23] sm:$0xff]  ;;  %627 = vmatpush.bf16.msra.mxu0 %v1502_v0  ;;  %1694 = vmatpush.bf16.msra.mxu1 %v1502_v0  ;;  %v1479_v4 = vld [vmem:[%s1797_s23 + $0x48] sm:$0xff]  ;;  %v1480_v7 = vld [vmem:[%s1797_s23 + $0x50] sm:$0xff]  ;;  %s289_s9 = scalar_lea.vmem %s2214_s4, %s2220_s15 }
  0x11   : > { %v1478_v2 = vld [vmem:[%s1797_s23 + $0x40] sm:$0xff]  ;;  %1695 = vmatpush.bf16.msra.mxu2 %v1502_v0  ;;  %1696 = vmatpush.bf16.msra.mxu3 %v1502_v0  ;;  %v1487_v8 = vld [vmem:[%s1797_s23 + $0x88] sm:$0xff]  ;;  %v1473_v9 = vld [vmem:[%s1797_s23 + $0x18] sm:$0xff] }
  0x12   : > { %v1486_v5 = vld [vmem:[%s1797_s23 + $0x80] sm:$0xff]  ;;  %v1481_v10 = vld [vmem:[%s1797_s23 + $0x58] sm:$0xff]  ;;  %v1488_v11 = vld [vmem:[%s1797_s23 + $0x90] sm:$0xff] }
  0x13   : > { %1433 = vmatmul.msk.bf16.vlgmr.msra.gmra.mxu0 %vm523_vm0, %v1470_v1  ;;  %1441 = vmatmul.msk.bf16.vlgmr.msra.gmra.mxu1 %vm523_vm0, %v1478_v2  ;;  %v1494_v12 = vld [vmem:[%s1797_s23 + $0xc0] sm:$0xff]  ;;  %v1489_v15 = vld [vmem:[%s1797_s23 + $0x98] sm:$0xff]  ;;  %v1495_v16 = vld [vmem:[%s1797_s23 + $0xc8] sm:$0xff] }
  0x14   : > { %1449 = vmatmul.msk.bf16.vlgmr.msra.gmra.mxu2 %vm523_vm0, %v1486_v5  ;;  %1457 = vmatmul.msk.bf16.vlgmr.msra.gmra.mxu3 %vm523_vm0, %v1494_v12  ;;  %v1474_v13 = vld [vmem:[%s1797_s23 + $0x20] sm:$0xff]  ;;  %v1475_v17 = vld [vmem:[%s1797_s23 + $0x28] sm:$0xff]  ;;  %v1496_v20 = vld [vmem:[%s1797_s23 + $0xd0] sm:$0xff] }
  0x15   : > { %v1482_v14 = vld [vmem:[%s1797_s23 + $0x60] sm:$0xff]  ;;  %v1483_v18 = vld [vmem:[%s1797_s23 + $0x68] sm:$0xff]  ;;  %v1476_v21 = vld [vmem:[%s1797_s23 + $0x30] sm:$0xff] }
  0x16   : > { %v1490_v19 = vld [vmem:[%s1797_s23 + $0xa0] sm:$0xff]  ;;  %v1484_v22 = vld [vmem:[%s1797_s23 + $0x70] sm:$0xff]  ;;  %v1491_v23 = vld [vmem:[%s1797_s23 + $0xa8] sm:$0xff] }
  0x17   : > { %v1497_v24 = vld [vmem:[%s1797_s23 + $0xd8] sm:$0xff]  ;;  %v1492_v27 = vld [vmem:[%s1797_s23 + $0xb0] sm:$0xff]  ;;  %v1498_v28 = vld [vmem:[%s1797_s23 + $0xe0] sm:$0xff] }
  0x18   : > { %v1477_v25 = vld [vmem:[%s1797_s23 + $0x38] sm:$0xff]  ;;  %v1499_v32 = vld [vmem:[%s1797_s23 + $0xe8] sm:$0xff]  ;;  %v1500_v46 = vld [vmem:[%s1797_s23 + $0xf0] sm:$0xff] }
  0x19   : > { %v1485_v26 = vld [vmem:[%s1797_s23 + $0x78] sm:$0xff] }
  0x1a   : > { %v1493_v31 = vld [vmem:[%s1797_s23 + $0xb8] sm:$0xff] }
  0x1b   : > { %v1501_v62 = vld [vmem:[%s1797_s23 + $0xf8] sm:$0xff] }
  0x23   : > { %1434 = vmatmul.msk.bf16.gmra.mxu0 %vm523_vm0, %v1471_v3  ;;  %1442 = vmatmul.msk.bf16.gmra.mxu1 %vm523_vm0, %v1479_v4 }
  0x24   : > { %1450 = vmatmul.msk.bf16.gmra.mxu2 %vm523_vm0, %v1487_v8  ;;  %1458 = vmatmul.msk.bf16.gmra.mxu3 %vm523_vm0, %v1495_v16 }
  0x33   : > { %1435 = vmatmul.msk.bf16.gmra.mxu0 %vm523_vm0, %v1472_v6  ;;  %1443 = vmatmul.msk.bf16.gmra.mxu1 %vm523_vm0, %v1480_v7 }
  0x34   : > { %1451 = vmatmul.msk.bf16.gmra.mxu2 %vm523_vm0, %v1488_v11  ;;  %1459 = vmatmul.msk.bf16.gmra.mxu3 %vm523_vm0, %v1496_v20 }
  0x43   : > { %1436 = vmatmul.msk.bf16.gmra.mxu0 %vm523_vm0, %v1473_v9  ;;  %1444 = vmatmul.msk.bf16.gmra.mxu1 %vm523_vm0, %v1481_v10 }
  0x44   : > { %1452 = vmatmul.msk.bf16.gmra.mxu2 %vm523_vm0, %v1489_v15  ;;  %1460 = vmatmul.msk.bf16.gmra.mxu3 %vm523_vm0, %v1497_v24 }
  0x53   : > { %1437 = vmatmul.msk.bf16.gmra.mxu0 %vm523_vm0, %v1474_v13  ;;  %1445 = vmatmul.msk.bf16.gmra.mxu1 %vm523_vm0, %v1482_v14 }
  0x54   : > { %1453 = vmatmul.msk.bf16.gmra.mxu2 %vm523_vm0, %v1490_v19  ;;  %1461 = vmatmul.msk.bf16.gmra.mxu3 %vm523_vm0, %v1498_v28 }
  0x63   : > { %1438 = vmatmul.msk.bf16.gmra.mxu0 %vm523_vm0, %v1475_v17  ;;  %1446 = vmatmul.msk.bf16.gmra.mxu1 %vm523_vm0, %v1483_v18 }
  0x64   : > { %1454 = vmatmul.msk.bf16.gmra.mxu2 %vm523_vm0, %v1491_v23  ;;  %1462 = vmatmul.msk.bf16.gmra.mxu3 %vm523_vm0, %v1499_v32 }
  0x73   : > { %1439 = vmatmul.msk.bf16.gmra.mxu0 %vm523_vm0, %v1476_v21  ;;  %1447 = vmatmul.msk.bf16.gmra.mxu1 %vm523_vm0, %v1484_v22 }
  0x74   : > { %1455 = vmatmul.msk.bf16.gmra.mxu2 %vm523_vm0, %v1492_v27  ;;  %1463 = vmatmul.msk.bf16.gmra.mxu3 %vm523_vm0, %v1500_v46 }
  0x83   : > { %1440 = vmatmul.msk.bf16.gmra.mxu0 %vm523_vm0, %v1477_v25  ;;  %1448 = vmatmul.msk.bf16.gmra.mxu1 %vm523_vm0, %v1485_v26 }
  0x84   : > { %1456 = vmatmul.msk.bf16.gmra.mxu2 %vm523_vm0, %v1493_v31  ;;  %1464 = vmatmul.msk.bf16.gmra.mxu3 %vm523_vm0, %v1501_v62 }
  0x90   : > { %v629_v29 = vpop.f32.mrf.mxu0  ;;  %v1858_v30 = vpop.f32.mrf.mxu1 }
  0x91   : > { %v987_v33 = vmul.f32 %v629_v29, %v629_v29 }
  0x97   : > { %v1885_v53 = vpop.f32.mrf.mxu2  ;;  %v1923_v13 = vpop.f32.mrf.mxu3 }
  0x98   : > { %v631_v34 = vpop.f32.mrf.mxu0  ;;  %v1871_v35 = vpop.f32.mrf.mxu1 }
  0x99   : > { %v1506_v36 = vpack.c.bf16 %v631_v34, %v629_v29  ;;  %v917_v37 = vadd.f32 %v631_v34, %v629_v29  ;;  %v988_v38 = vmul.f32 %v631_v34, %v631_v34  ;;  %v1546_v39 = vpack.c.bf16 %v1871_v35, %v1858_v30 }
  0x9b   : > { %1507 = vst [vmem:[%s1869_s29] sm:$0xff] %v1506_v36   ;;  %v1051_v40 = vadd.f32 %v988_v38, %v987_v33 }
  0x9c   : > { %1670 = vst [vmem:[%s1869_s29 + $0x40] sm:$0xff] %v1546_v39  }
  0x9f   : > { %v1893_v59 = vpop.f32.mrf.mxu2  ;;  %v1931_v17 = vpop.f32.mrf.mxu3 }
  0xa0   : > { %v634_v41 = vpop.f32.mrf.mxu0  ;;  %v1877_v42 = vpop.f32.mrf.mxu1  ;;  %v1586_v60 = vpack.c.bf16 %v1893_v59, %v1885_v53  ;;  %v1626_v19 = vpack.c.bf16 %v1931_v17, %v1923_v13 }
  0xa1   : > { %v918_v43 = vadd.f32 %v917_v37, %v634_v41  ;;  %v989_v44 = vmul.f32 %v634_v41, %v634_v41 }
  0xa2   : > { %1678 = vst [vmem:[%s1869_s29 + $0x80] sm:$0xff] %v1586_v60  }
  0xa3   : > { %v1052_v45 = vadd.f32 %v1051_v40, %v989_v44  ;;  %1686 = vst [vmem:[%s1869_s29 + $0xc0] sm:$0xff] %v1626_v19  }
  0xa7   : > { %v1906_v3 = vpop.f32.mrf.mxu2  ;;  %v1945_v25 = vpop.f32.mrf.mxu3 }
  0xa8   : > { %v636_v47 = vpop.f32.mrf.mxu0  ;;  %v1881_v48 = vpop.f32.mrf.mxu1 }
  0xa9   : > { %v1511_v49 = vpack.c.bf16 %v636_v47, %v634_v41  ;;  %v919_v50 = vadd.f32 %v918_v43, %v636_v47  ;;  %v990_v51 = vmul.f32 %v636_v47, %v636_v47  ;;  %v1551_v52 = vpack.c.bf16 %v1881_v48, %v1877_v42 }
  0xab   : > { %1663 = vst [vmem:[%s1869_s29 + $0x8] sm:$0xff] %v1511_v49   ;;  %v1053_v54 = vadd.f32 %v1052_v45, %v990_v51 }
  0xac   : > { %1671 = vst [vmem:[%s1869_s29 + $0x48] sm:$0xff] %v1551_v52  }
  0xaf   : > { %v1912_v6 = vpop.f32.mrf.mxu2  ;;  %v1953_v29 = vpop.f32.mrf.mxu3 }
  0xb0   : > { %v639_v55 = vpop.f32.mrf.mxu0  ;;  %v1889_v56 = vpop.f32.mrf.mxu1  ;;  %v1591_v7 = vpack.c.bf16 %v1912_v6, %v1906_v3  ;;  %v1631_v32 = vpack.c.bf16 %v1953_v29, %v1945_v25 }
  0xb1   : > { %v1891_v57 = vadd.f32 %v919_v50, %v639_v55  ;;  %v991_v58 = vmul.f32 %v639_v55, %v639_v55 }
  0xb2   : > { %1679 = vst [vmem:[%s1869_s29 + $0x88] sm:$0xff] %v1591_v7  }
  0xb3   : > { %v1897_v61 = vadd.f32 %v1053_v54, %v991_v58  ;;  %1687 = vst [vmem:[%s1869_s29 + $0xc8] sm:$0xff] %v1631_v32  }
  0xb7   : > { %v1921_v12 = vpop.f32.mrf.mxu2  ;;  %v1967_v39 = vpop.f32.mrf.mxu3 }
  0xb8   : > { %v641_v63 = vpop.f32.mrf.mxu0  ;;  %v1902_v0 = vpop.f32.mrf.mxu1 }
  0xb9   : > { %v1516_v1 = vpack.c.bf16 %v641_v63, %v639_v55  ;;  %v1556_v2 = vpack.c.bf16 %v1902_v0, %v1889_v56  ;;  %v992_v45 = vmul.f32 %v641_v63, %v641_v63  ;;  %v921_v50 = vadd.f32 %v1891_v57, %v641_v63 }
  0xbb   : > { %1664 = vst [vmem:[%s1869_s29 + $0x10] sm:$0xff] %v1516_v1   ;;  %v1055_v51 = vadd.f32 %v1897_v61, %v992_v45 }
  0xbc   : > { %1672 = vst [vmem:[%s1869_s29 + $0x50] sm:$0xff] %v1556_v2  }
  0xbf   : > { %v1929_v16 = vpop.f32.mrf.mxu2  ;;  %v1975_v44 = vpop.f32.mrf.mxu3 }
  0xc0   : > { %v644_v4 = vpop.f32.mrf.mxu0  ;;  %v1910_v5 = vpop.f32.mrf.mxu1  ;;  %v1596_v18 = vpack.c.bf16 %v1929_v16, %v1921_v12  ;;  %v1636_v47 = vpack.c.bf16 %v1975_v44, %v1967_v39 }
  0xc1   : > { %v993_v49 = vmul.f32 %v644_v4, %v644_v4  ;;  %v922_v54 = vadd.f32 %v921_v50, %v644_v4 }
  0xc2   : > { %1680 = vst [vmem:[%s1869_s29 + $0x90] sm:$0xff] %v1596_v18  }
  0xc3   : > { %1688 = vst [vmem:[%s1869_s29 + $0xd0] sm:$0xff] %v1636_v47   ;;  %v1056_v55 = vadd.f32 %v1055_v51, %v993_v49 }
  0xc7   : > { %v1943_v24 = vpop.f32.mrf.mxu2  ;;  %v1991_v57 = vpop.f32.mrf.mxu3 }
  0xc8   : > { %v646_v8 = vpop.f32.mrf.mxu0  ;;  %v1917_v9 = vpop.f32.mrf.mxu1 }
  0xc9   : > { %v1521_v10 = vpack.c.bf16 %v646_v8, %v644_v4  ;;  %v1561_v11 = vpack.c.bf16 %v1917_v9, %v1910_v5  ;;  %v994_v52 = vmul.f32 %v646_v8, %v646_v8  ;;  %v923_v1 = vadd.f32 %v922_v54, %v646_v8 }
  0xcb   : > { %1665 = vst [vmem:[%s1869_s29 + $0x18] sm:$0xff] %v1521_v10   ;;  %v1057_v63 = vadd.f32 %v1056_v55, %v994_v52 }
  0xcc   : > { %1673 = vst [vmem:[%s1869_s29 + $0x58] sm:$0xff] %v1561_v11  }
  0xcf   : > { %v1951_v28 = vpop.f32.mrf.mxu2  ;;  %v1999_v47 = vpop.f32.mrf.mxu3 }
  0xd0   : > { %v649_v14 = vpop.f32.mrf.mxu0  ;;  %v1927_v15 = vpop.f32.mrf.mxu1  ;;  %v1601_v31 = vpack.c.bf16 %v1951_v28, %v1943_v24  ;;  %v1641_v50 = vpack.c.bf16 %v1999_v47, %v1991_v57 }
  0xd1   : > { %v995_v58 = vmul.f32 %v649_v14, %v649_v14  ;;  %v924_v61 = vadd.f32 %v923_v1, %v649_v14 }
  0xd2   : > { %1681 = vst [vmem:[%s1869_s29 + $0x98] sm:$0xff] %v1601_v31  }
  0xd3   : > { %v1058_v4 = vadd.f32 %v1057_v63, %v995_v58  ;;  %1689 = vst [vmem:[%s1869_s29 + $0xd8] sm:$0xff] %v1641_v50  }
  0xd7   : > { %v1965_v38 = vpop.f32.mrf.mxu2 }
  0xd8   : > { %v651_v20 = vpop.f32.mrf.mxu0  ;;  %v1939_v21 = vpop.f32.mrf.mxu1 }
  0xd9   : > { %v1526_v22 = vpack.c.bf16 %v651_v20, %v649_v14  ;;  %v1566_v23 = vpack.c.bf16 %v1939_v21, %v1927_v15  ;;  %v996_v11 = vmul.f32 %v651_v20, %v651_v20  ;;  %v925_v19 = vadd.f32 %v924_v61, %v651_v20 }
  0xdb   : > { %1666 = vst [vmem:[%s1869_s29 + $0x20] sm:$0xff] %v1526_v22   ;;  %v1059_v22 = vadd.f32 %v1058_v4, %v996_v11  ;;  %v2013_v4 = vpop.f32.mrf.mxu3 }
  0xdc   : > { %1674 = vst [vmem:[%s1869_s29 + $0x60] sm:$0xff] %v1566_v23  }
  0xdf   : > { %v1973_v43 = vpop.f32.mrf.mxu2 }
  0xe0   : > { %v654_v26 = vpop.f32.mrf.mxu0  ;;  %v1949_v27 = vpop.f32.mrf.mxu1  ;;  %v1606_v46 = vpack.c.bf16 %v1973_v43, %v1965_v38 }
  0xe1   : > { %v997_v18 = vmul.f32 %v654_v26, %v654_v26  ;;  %v926_v8 = vadd.f32 %v925_v19, %v654_v26 }
  0xe2   : > { %1682 = vst [vmem:[%s1869_s29 + $0xa0] sm:$0xff] %v1606_v46  }
  0xe3   : > { %v1060_v31 = vadd.f32 %v1059_v22, %v997_v18  ;;  %v1004_v22 = vmul.f32 %v1871_v35, %v1871_v35 }
  0xe7   : > { %v1989_v10 = vpop.f32.mrf.mxu2 }
  0xe8   : > { %v656_v33 = vpop.f32.mrf.mxu0  ;;  %v1961_v34 = vpop.f32.mrf.mxu1 }
  0xe9   : > { %v1531_v36 = vpack.c.bf16 %v656_v33, %v654_v26  ;;  %v1571_v37 = vpack.c.bf16 %v1961_v34, %v1949_v27  ;;  %v998_v23 = vmul.f32 %v656_v33, %v656_v33  ;;  %v927_v45 = vadd.f32 %v926_v8, %v656_v33 }
  0xeb   : > { %1667 = vst [vmem:[%s1869_s29 + $0x28] sm:$0xff] %v1531_v36   ;;  %v1061_v14 = vadd.f32 %v1060_v31, %v998_v23  ;;  %v1005_v31 = vmul.f32 %v1877_v42, %v1877_v42 }
  0xec   : > { %1675 = vst [vmem:[%s1869_s29 + $0x68] sm:$0xff] %v1571_v37  }
  0xef   : > { %v1997_v46 = vpop.f32.mrf.mxu2 }
  0xf0   : > { %v659_v40 = vpop.f32.mrf.mxu0  ;;  %v1971_v41 = vpop.f32.mrf.mxu1  ;;  %v1611_v20 = vpack.c.bf16 %v1997_v46, %v1989_v10 }
  0xf1   : > { %v999_v32 = vmul.f32 %v659_v40, %v659_v40  ;;  %v928_v26 = vadd.f32 %v927_v45, %v659_v40  ;;  %v1006_v45 = vmul.f32 %v1881_v48, %v1881_v48 }
  0xf2   : > { %1683 = vst [vmem:[%s1869_s29 + $0xa8] sm:$0xff] %v1611_v20   ;;  %v2031_v20 = vpop.f32.mrf.mxu3 }
  0xf3   : > { %v1062_v51 = vadd.f32 %v1061_v14, %v999_v32  ;;  %v1646_v50 = vpack.c.bf16 %v2031_v20, %v2013_v4 }
  0xf5   : > { %1690 = vst [vmem:[%s1869_s29 + $0xe0] sm:$0xff] %v1646_v50  }
  0xf8   : > { %v661_v60 = vpop.f32.mrf.mxu0  ;;  %v1985_v62 = vpop.f32.mrf.mxu1 }
  0xf9   : > { %v1536_v2 = vpack.c.bf16 %v661_v60, %v659_v40  ;;  %v1576_v7 = vpack.c.bf16 %v1985_v62, %v1971_v41  ;;  %v1000_v49 = vmul.f32 %v661_v60, %v661_v60  ;;  %v929_v54 = vadd.f32 %v928_v26, %v661_v60  ;;  %v2011_v40 = vpop.f32.mrf.mxu2 }
  0xfa   : > { %v1003_v60 = vmul.f32 %v1858_v30, %v1858_v30  ;;  %v1016_v50 = vmul.f32 %v1985_v62, %v1985_v62 }
  0xfb   : > { %1668 = vst [vmem:[%s1869_s29 + $0x30] sm:$0xff] %v1536_v2   ;;  %v1063_v33 = vadd.f32 %v1062_v51, %v1000_v49 }
  0xfc   : > { %1676 = vst [vmem:[%s1869_s29 + $0x70] sm:$0xff] %v1576_v7  }
 0x100   : > { %v664_v36 = vpop.f32.mrf.mxu0  ;;  %v1995_v37 = vpop.f32.mrf.mxu1 }
 0x101   : > { %v1001_v52 = vmul.f32 %v664_v36, %v664_v36  ;;  %v930_v55 = vadd.f32 %v929_v54, %v664_v36  ;;  %v2029_v49 = vpop.f32.mrf.mxu2 }
 0x103   : > { %v1064_v58 = vadd.f32 %v1063_v33, %v1001_v52  ;;  %v1009_v33 = vmul.f32 %v1910_v5, %v1910_v5 }
 0x108   : > { %v666_v1 = vpop.f32.mrf.mxu0  ;;  %v2007_v2 = vpop.f32.mrf.mxu1 }
 0x109   : > { %v1541_v7 = vpack.c.bf16 %v666_v1, %v664_v36  ;;  %v931_v63 = vadd.f32 %v930_v55, %v666_v1  ;;  %v1002_v11 = vmul.f32 %v666_v1, %v666_v1  ;;  %v1581_v61 = vpack.c.bf16 %v2007_v2, %v1995_v37 }
 0x10a   : > { %v1010_v1 = vmul.f32 %v1917_v9, %v1917_v9 }
 0x10b   : > { %1669 = vst [vmem:[%s1869_s29 + $0x38] sm:$0xff] %v1541_v7   ;;  %v932_v18 = vadd.f32 %v931_v63, %v1858_v30  ;;  %v1065_v19 = vadd.f32 %v1064_v58, %v1002_v11  ;;  %v2051_v63 = vpop.f32.mrf.mxu2  ;;  %v2053_v11 = vpop.f32.mrf.mxu3 }
 0x10c   : > { %1677 = vst [vmem:[%s1869_s29 + $0x78] sm:$0xff] %v1581_v61  }
 0x10d   : > { %v933_v23 = vadd.f32 %v932_v18, %v1871_v35  ;;  %v1066_v8 = vadd.f32 %v1065_v19, %v1003_v60  ;;  %v1616_v35 = vpack.c.bf16 %v2029_v49, %v2011_v40  ;;  %v1012_v18 = vmul.f32 %v1939_v21, %v1939_v21 }
 0x10f   : > { %v934_v32 = vadd.f32 %v933_v23, %v1877_v42  ;;  %v1067_v36 = vadd.f32 %v1066_v8, %v1004_v22  ;;  %v1007_v42 = vmul.f32 %v1889_v56, %v1889_v56  ;;  %1684 = vst [vmem:[%s1869_s29 + $0xb0] sm:$0xff] %v1616_v35   ;;  %v1014_v8 = vmul.f32 %v1961_v34, %v1961_v34 }
 0x111   : > { %v935_v30 = vadd.f32 %v934_v32, %v1881_v48  ;;  %v1068_v14 = vadd.f32 %v1067_v36, %v1005_v31  ;;  %v1008_v48 = vmul.f32 %v1902_v0, %v1902_v0 }
 0x113   : > { %v936_v26 = vadd.f32 %v935_v30, %v1889_v56  ;;  %v1069_v51 = vadd.f32 %v1068_v14, %v1006_v45  ;;  %v2067_v32 = vpop.f32.mrf.mxu2  ;;  %v2069_v36 = vpop.f32.mrf.mxu3  ;;  %v1015_v30 = vmul.f32 %v1971_v41, %v1971_v41 }
 0x114   : > { %v1651_v45 = vpack.c.bf16 %v2069_v36, %v2053_v11 }
 0x115   : > { %v937_v52 = vadd.f32 %v936_v26, %v1902_v0  ;;  %v1070_v54 = vadd.f32 %v1069_v51, %v1007_v42  ;;  %v1011_v0 = vmul.f32 %v1927_v15, %v1927_v15  ;;  %v1017_v51 = vmul.f32 %v1995_v37, %v1995_v37 }
 0x116   : > { %1691 = vst [vmem:[%s1869_s29 + $0xe8] sm:$0xff] %v1651_v45   ;;  %v1027_v45 = vmul.f32 %v1965_v38, %v1965_v38 }
 0x117   : > { %v1071_v55 = vadd.f32 %v1070_v54, %v1008_v48  ;;  %v938_v58 = vadd.f32 %v937_v52, %v1910_v5 }
 0x119   : > { %v939_v56 = vadd.f32 %v938_v58, %v1917_v9  ;;  %v1072_v7 = vadd.f32 %v1071_v55, %v1009_v33  ;;  %v1013_v9 = vmul.f32 %v1949_v27, %v1949_v27  ;;  %v1019_v33 = vmul.f32 %v1885_v53, %v1885_v53 }
 0x11a   : > { %v1020_v58 = vmul.f32 %v1893_v59, %v1893_v59 }
 0x11b   : > { %v940_v61 = vadd.f32 %v939_v56, %v1927_v15  ;;  %v1073_v60 = vadd.f32 %v1072_v7, %v1010_v1  ;;  %v2089_v54 = vpop.f32.mrf.mxu3  ;;  %v1021_v56 = vmul.f32 %v1906_v3, %v1906_v3 }
 0x11d   : > { %v941_v5 = vadd.f32 %v940_v61, %v1939_v21  ;;  %v1074_v19 = vadd.f32 %v1073_v60, %v1011_v0  ;;  %v1621_v21 = vpack.c.bf16 %v2067_v32, %v2051_v63  ;;  %v1022_v0 = vmul.f32 %v1912_v6, %v1912_v6 }
 0x11f   : > { %v942_v22 = vadd.f32 %v941_v5, %v1949_v27  ;;  %v1075_v23 = vadd.f32 %v1074_v19, %v1012_v18  ;;  %1685 = vst [vmem:[%s1869_s29 + $0xb8] sm:$0xff] %v1621_v21  }
 0x121   : > { %v943_v15 = vadd.f32 %v942_v22, %v1961_v34  ;;  %v1076_v31 = vadd.f32 %v1075_v23, %v1013_v9 }
 0x123   : > { %v944_v27 = vadd.f32 %v943_v15, %v1971_v41  ;;  %v1077_v14 = vadd.f32 %v1076_v31, %v1014_v8  ;;  %v1018_v41 = vmul.f32 %v2007_v2, %v2007_v2  ;;  %v2103_v60 = vpop.f32.mrf.mxu3  ;;  %v1026_v15 = vmul.f32 %v1951_v28, %v1951_v28 }
 0x124   : > { %v1656_v18 = vpack.c.bf16 %v2103_v60, %v2089_v54 }
 0x125   : > { %v1078_v35 = vadd.f32 %v1077_v14, %v1015_v30  ;;  %v945_v34 = vadd.f32 %v944_v27, %v1985_v62  ;;  %v1028_v30 = vmul.f32 %v1973_v43, %v1973_v43 }
 0x126   : > { %1692 = vst [vmem:[%s1869_s29 + $0xf0] sm:$0xff] %v1656_v18  }
 0x127   : > { %v1079_v42 = vadd.f32 %v1078_v35, %v1016_v50  ;;  %v946_v26 = vadd.f32 %v945_v34, %v1995_v37  ;;  %v1029_v35 = vmul.f32 %v1989_v10, %v1989_v10 }
 0x129   : > { %v1080_v48 = vadd.f32 %v1079_v42, %v1017_v51  ;;  %v947_v52 = vadd.f32 %v946_v26, %v2007_v2  ;;  %v1030_v42 = vmul.f32 %v1997_v46, %v1997_v46 }
 0x12b   : > { %v948_v62 = vadd.f32 %v947_v52, %v1885_v53  ;;  %v1081_v55 = vadd.f32 %v1080_v48, %v1018_v41  ;;  %v2120_v21 = vpop.f32.mrf.mxu3 }
 0x12d   : > { %v949_v37 = vadd.f32 %v948_v62, %v1893_v59  ;;  %v1082_v1 = vadd.f32 %v1081_v55, %v1019_v33  ;;  %v1023_v59 = vmul.f32 %v1921_v12, %v1921_v12  ;;  %v1032_v33 = vmul.f32 %v2029_v49, %v2029_v49 }
 0x12e   : > { %v1033_v55 = vmul.f32 %v2051_v63, %v2051_v63 }
 0x12f   : > { %v950_v2 = vadd.f32 %v949_v37, %v1906_v3  ;;  %v1083_v7 = vadd.f32 %v1082_v1, %v1020_v58  ;;  %v1024_v3 = vmul.f32 %v1929_v16, %v1929_v16  ;;  %v1034_v1 = vmul.f32 %v2067_v32, %v2067_v32 }
 0x131   : > { %v951_v61 = vadd.f32 %v950_v2, %v1912_v6  ;;  %v1084_v53 = vadd.f32 %v1083_v7, %v1021_v56  ;;  %v1025_v6 = vmul.f32 %v1943_v24, %v1943_v24 }
 0x133   : > { %v952_v5 = vadd.f32 %v951_v61, %v1921_v12  ;;  %v1085_v19 = vadd.f32 %v1084_v53, %v1022_v0  ;;  %v786_v26 = vpop.f32.mrf.mxu3 }
 0x134   : > { %v1661_v51 = vpack.c.bf16 %v786_v26, %v2120_v21 }
 0x135   : > { %v953_v9 = vadd.f32 %v952_v5, %v1929_v16  ;;  %v1086_v22 = vadd.f32 %v1085_v19, %v1023_v59 }
 0x136   : > { %1693 = vst [vmem:[%s1869_s29 + $0xf8] sm:$0xff] %v1661_v51   ;;  %v1050_v51 = vmul.f32 %v786_v26, %v786_v26 }
 0x137   : > { %v1087_v23 = vadd.f32 %v1086_v22, %v1024_v3  ;;  %v954_v8 = vadd.f32 %v953_v9, %v1943_v24 }
 0x139   : > { %v955_v31 = vadd.f32 %v954_v8, %v1951_v28  ;;  %v1088_v12 = vadd.f32 %v1087_v23, %v1025_v6 }
 0x13b   : > { %v956_v16 = vadd.f32 %v955_v31, %v1965_v38  ;;  %v1089_v27 = vadd.f32 %v1088_v12, %v1026_v15 }
 0x13d   : > { %v957_v24 = vadd.f32 %v956_v16, %v1973_v43  ;;  %v1090_v14 = vadd.f32 %v1089_v27, %v1027_v45  ;;  %v1031_v43 = vmul.f32 %v2011_v40, %v2011_v40 }
 0x13f   : > { %v958_v28 = vadd.f32 %v957_v24, %v1989_v10  ;;  %v1091_v34 = vadd.f32 %v1090_v14, %v1028_v30  ;;  %v1046_v30 = vmul.f32 %v2069_v36, %v2069_v36 }
 0x141   : > { %v959_v50 = vadd.f32 %v958_v28, %v1997_v46  ;;  %v1092_v38 = vadd.f32 %v1091_v34, %v1029_v35  ;;  %v1047_v35 = vmul.f32 %v2089_v54, %v2089_v54  ;;  %v1048_v34 = vmul.f32 %v2103_v60, %v2103_v60 }
 0x143   : > { %v1093_v48 = vadd.f32 %v1092_v38, %v1030_v42  ;;  %v960_v52 = vadd.f32 %v959_v50, %v2011_v40  ;;  %v1035_v40 = vmul.f32 %v1923_v13, %v1923_v13 }
 0x145   : > { %v1094_v41 = vadd.f32 %v1093_v48, %v1031_v43  ;;  %v961_v10 = vadd.f32 %v960_v52, %v2029_v49  ;;  %v1036_v49 = vmul.f32 %v1931_v17, %v1931_v17 }
 0x147   : > { %v1095_v62 = vadd.f32 %v1094_v41, %v1032_v33  ;;  %v962_v46 = vadd.f32 %v961_v10, %v2051_v63  ;;  %v1037_v63 = vmul.f32 %v1945_v25, %v1945_v25 }
 0x149   : > { %v1096_v58 = vadd.f32 %v1095_v62, %v1033_v55  ;;  %v963_v37 = vadd.f32 %v962_v46, %v2067_v32  ;;  %v1038_v32 = vmul.f32 %v1953_v29, %v1953_v29 }
 0x14b   : > { %v964_v56 = vadd.f32 %v963_v37, %v1923_v13  ;;  %v1097_v2 = vadd.f32 %v1096_v58, %v1034_v1  ;;  %v1039_v13 = vmul.f32 %v1967_v39, %v1967_v39 }
 0x14d   : > { %v965_v7 = vadd.f32 %v964_v56, %v1931_v17  ;;  %v1098_v0 = vadd.f32 %v1097_v2, %v1035_v40  ;;  %v1040_v17 = vmul.f32 %v1975_v44, %v1975_v44 }
 0x14f   : > { %v966_v61 = vadd.f32 %v965_v7, %v1945_v25  ;;  %v1099_v53 = vadd.f32 %v1098_v0, %v1036_v49  ;;  %v1041_v25 = vmul.f32 %v1991_v57, %v1991_v57 }
 0x151   : > { %v967_v18 = vadd.f32 %v966_v61, %v1953_v29  ;;  %v1100_v59 = vadd.f32 %v1099_v53, %v1037_v63  ;;  %v1042_v29 = vmul.f32 %v1999_v47, %v1999_v47 }
 0x153   : > { %v968_v5 = vadd.f32 %v967_v18, %v1967_v39  ;;  %v1101_v19 = vadd.f32 %v1100_v59, %v1038_v32  ;;  %v1043_v39 = vmul.f32 %v2013_v4, %v2013_v4 }
 0x155   : > { %v969_v3 = vadd.f32 %v968_v5, %v1975_v44  ;;  %v1102_v9 = vadd.f32 %v1101_v19, %v1039_v13  ;;  %v1044_v44 = vmul.f32 %v2031_v20, %v2031_v20 }
 0x157   : > { %v1103_v22 = vadd.f32 %v1102_v9, %v1040_v17  ;;  %v970_v6 = vadd.f32 %v969_v3, %v1991_v57  ;;  %v1045_v57 = vmul.f32 %v2053_v11, %v2053_v11 }
 0x159   : > { %v971_v23 = vadd.f32 %v970_v6, %v1999_v47  ;;  %v1104_v8 = vadd.f32 %v1103_v22, %v1041_v25 }
 0x15b   : > { %v972_v15 = vadd.f32 %v971_v23, %v2013_v4  ;;  %v1105_v31 = vadd.f32 %v1104_v8, %v1042_v29 }
 0x15d   : > { %v973_v12 = vadd.f32 %v972_v15, %v2031_v20  ;;  %v1106_v45 = vadd.f32 %v1105_v31, %v1043_v39 }
 0x15f   : > { %v974_v16 = vadd.f32 %v973_v12, %v2053_v11  ;;  %v1107_v27 = vadd.f32 %v1106_v45, %v1044_v44 }
 0x161   : > { %v975_v47 = vadd.f32 %v974_v16, %v2069_v36  ;;  %v1108_v24 = vadd.f32 %v1107_v27, %v1045_v57  ;;  %v1049_v36 = vmul.f32 %v2120_v21, %v2120_v21 }
 0x163   : > { %v1109_v4 = vadd.f32 %v1108_v24, %v1046_v30  ;;  %v976_v14 = vadd.f32 %v975_v47, %v2089_v54 }
 0x165   : > { %v1110_v20 = vadd.f32 %v1109_v4, %v1047_v35  ;;  %v977_v28 = vadd.f32 %v976_v14, %v2103_v60 }
 0x167   : > { %v1111_v11 = vadd.f32 %v1110_v20, %v1048_v34  ;;  %v978_v50 = vadd.f32 %v977_v28, %v2120_v21 }
 0x169   : > { %v1112_v42 = vadd.f32 %v1111_v11, %v1049_v36  ;;  %v979_v38 = vadd.f32 %v978_v50, %v786_v26 }
 0x16b   : > { %v980_v48 = vrot.slane %v979_v38, 4  ;;  %v1113_v52 = vadd.f32 %v1112_v42, %v1050_v51 }
 0x16d   : > { %v981_v54 = vadd.f32 %v980_v48, %v979_v38  ;;  %v1114_v43 = vrot.slane %v1113_v52, 4 }
 0x16f   : > { %v982_v41 = vrot.slane %v981_v54, 2  ;;  %v1115_v10 = vadd.f32 %v1114_v43, %v1113_v52 }
 0x171   : > { %v983_v33 = vadd.f32 %v982_v41, %v981_v54  ;;  %v1116_v62 = vrot.slane %v1115_v10, 2 }
 0x173   : > { %v984_v60 = vrot.slane %v983_v33, 1  ;;  %v1117_v46 = vadd.f32 %v1116_v62, %v1115_v10 }
 0x175   : > { %v985_v55 = vadd.f32 %v984_v60, %v983_v33  ;;  %v1118_v21 = vrot.slane %v1117_v46, 1 }
 0x177   : > { %986 = vst [vmem:[%s283_s6] sm:$0x1] %v985_v55  ;;  %v1119_v26 = vadd.f32 %v1118_v21, %v1117_v46 }
 0x179   : > { %1120 = vst [vmem:[%s289_s9] sm:$0x1] %v1119_v26 }
 0x17a PF: > { %s15_s17 = sadd.s32 1, %s1743_s17   ;;  %s2215_s15 = smov %s1739_s16 }
 0x17b   : > { %p12_p5 = scmp.ge.s32.totalorder %s15_s17, 6   ;;  %s2216_s16 = smov %s2218_s18 }
 0x17d   :  { %14 = sbr.rel (!%p12_p5) target bundleno = 2 (0x2), region = 85 }

</bundles_post_ra>
